<compile_context>
chip_gen: v7x
topology: tpu7x:2x2x1
jax: 0.10.0
libtpu: 0.0.40
codegen_flags: <defaults>
</compile_context>

<pallas_src>
import functools
import math

import jax
import jax.numpy as jnp
from jax.experimental import pallas as pl
from jax.experimental.pallas import tpu as pltpu


# ---------------------------------------------------------------------------
# Fused Pallas kernel
# ---------------------------------------------------------------------------

def _fused_kernel(
    own_ref, aid_ref, enemy_ref, ally_ref, h0_ref,
    w_own_ref, b_own_ref,
    he_w1_ref, he_b1_ref, he_w2_ref, he_b2_ref,
    ha_w1_ref, ha_b1_ref, ha_w2_ref, ha_b2_ref,
    s_en_ref, s_al_ref, r_en_ref, g_att_ref,
    g1_wi_ref, g1_wh_ref, g1_bi_ref, g1_bh_ref,
    fc2n_w_ref, fc2n_b_ref,
    g2_wi_ref, g2_wh_ref, g2_bi_ref, g2_bh_ref,
    enc_w1_ref, enc_b1_ref, enc_w2_ref, enc_b2_ref,
    fc3_w_ref, fc3_b_ref,
    mlp_wflat_ref, mlp_bd_ref, mlp_g2_ref, mlp_b_ref, rep_ag_ref,
    q_ref, hh_ref, localq_ref, qf_ref,
    *, H, d_en, d_al, n_agents,
):
    f32 = jnp.float32

    def mm(a, b):
        return jnp.dot(a, b, preferred_element_type=f32)

    own = own_ref[...]          # [N, d_own]
    enemy = enemy_ref[...]      # [NE, d_en]
    ally = ally_ref[...]        # [NA, d_al]
    h0 = h0_ref[...]            # [N, H]

    # fc1_own and fc1 (second path) fused into one matmul over concat weights.
    t = mm(own, w_own_ref[...]) + b_own_ref[...]                 # [N, 2H]
    emb_own = t[:, 0:H] + aid_ref[...]
    x2 = jnp.maximum(t[:, H:2 * H], 0.0)

    # hyper_enemy MLP; both Merger head-mixes are pre-folded into layer-2.
    he_h = jnp.maximum(mm(enemy, he_w1_ref[...]) + he_b1_ref[...], 0.0)
    a_out = mm(he_h, he_w2_ref[...]) + he_b2_ref[...]            # [NE, d_en*H + H + 1]
    # per-row contraction with enemy features over k (VPU, no MXU micro-matmuls)
    v_en = enemy[:, 0:1] * a_out[:, 0:H]
    for k in range(1, d_en):
        v_en = v_en + enemy[:, k:k + 1] * a_out[:, k * H:(k + 1) * H]
    emb_en = mm(s_en_ref[...], v_en)                             # [N, H] sum over enemies

    # hyper_ally MLP (non-MMM), same structure.
    ha_h = jnp.maximum(mm(ally, ha_w1_ref[...]) + ha_b1_ref[...], 0.0)
    b_out = mm(ha_h, ha_w2_ref[...]) + ha_b2_ref[...]            # [NA, d_al*H]
    v_al = ally[:, 0:1] * b_out[:, 0:H]
    for k in range(1, d_al):
        v_al = v_al + ally[:, k:k + 1] * b_out[:, k * H:(k + 1) * H]
    emb_al = mm(s_al_ref[...], v_al)                             # [N, H]

    x = jnp.maximum(emb_own + emb_en + emb_al, 0.0)              # [N, H]

    def gru(xin, h, wi_ref, wh_ref, bi_ref, bh_ref):
        gi = mm(xin, wi_ref[...]) + bi_ref[...]                  # [N, 3H] gates (r,z,n)
        gh = mm(h, wh_ref[...]) + bh_ref[...]
        r = jax.nn.sigmoid(gi[:, 0:H] + gh[:, 0:H])
        z = jax.nn.sigmoid(gi[:, H:2 * H] + gh[:, H:2 * H])
        n = jnp.tanh(gi[:, 2 * H:3 * H] + r * gh[:, 2 * H:3 * H])
        return (1.0 - z) * n + z * h

    hh = gru(x, h0, g1_wi_ref, g1_wh_ref, g1_bi_ref, g1_bh_ref)  # GRUCell  [N, H]

    # q_normal, already zero-padded into the full n_actions lane range.
    q_core = mm(hh, fc2n_w_ref[...]) + fc2n_b_ref[...]           # [N, n_actions]

    # attack head (heads pre-merged): per-enemy dot(hh, w) + b, scattered to its lane.
    hh_rep = mm(r_en_ref[...], hh)                               # [NE, H] (hh row per enemy)
    att_w = a_out[:, d_en * H:d_en * H + H]                      # [NE, H]
    att_b = a_out[:, d_en * H + H:d_en * H + H + 1]              # [NE, 1]
    t_att = jnp.sum(hh_rep * att_w, axis=1, keepdims=True) + att_b
    q_core = q_core + mm(s_en_ref[...], t_att * g_att_ref[...])  # [N, n_actions]

    # second (FOX) path: fc1 -> GRU (seq len 1) -> encoder (approx) -> fc3
    g_out = gru(x2, h0, g2_wi_ref, g2_wh_ref, g2_bi_ref, g2_bh_ref)   # [N, H]

    z_enc = mm(jnp.maximum(mm(g_out, enc_w1_ref[...]) + enc_b1_ref[...], 0.0),
               enc_w2_ref[...]) + enc_b2_ref[...]                # [N, H]
    q_f = mm(z_enc, fc3_w_ref[...]) + fc3_b_ref[...]             # [N, n_actions]

    # per-agent MLPs on the first n_agents rows of g_out, broadcast over batch
    # (block-diagonal extraction done with precomputed masks/selectors).
    g_first = g_out[:n_agents, :]                                # [n_agents, H]
    full = mm(g_first, mlp_wflat_ref[...])                       # [n_agents, n_agents*n_act]
    local3 = mm(full * mlp_bd_ref[...], mlp_g2_ref[...]) + mlp_b_ref[...]
    local_rows = mm(rep_ag_ref[...], local3)                     # [N, n_actions]

    q = q_core + local_rows + q_f

    q_ref[...] = q
    hh_ref[...] = hh
    localq_ref[...] = local_rows
    qf_ref[...] = q_f


def _full_spec(shape):
    nd = len(shape)
    return pl.BlockSpec(tuple(shape), lambda i, _nd=nd: (0,) * _nd)


# ---------------------------------------------------------------------------
# Forward wrapper (weight-only prep + single pallas_call)
# ---------------------------------------------------------------------------

def fox_hpns_forward(params, cfg, own_feats, enemy_feats, ally_feats,
                     agent_indices, hidden_state):
    n_agents, n_enemies, n_allies = cfg["n_agents"], cfg["n_enemies"], cfg["n_allies"]
    H, heads, hyp = cfg["rnn_hidden_dim"], cfg["hpn_head_num"], cfg["hpn_hyper_dim"]
    d_en, d_al = cfg["enemy_feats_dim"], cfg["ally_feats_dim"]
    n_norm, n_act = cfg["output_normal_actions"], cfg["n_actions"]
    N = own_feats.shape[0]
    bs = N // n_agents
    NE, NA = N * n_enemies, N * n_allies
    f32 = jnp.float32

    # -- Merger softmax weights (data independent) --
    if heads > 1:
        w_in = jax.nn.softmax(params["unify_input_heads_w"], axis=1)[0]          # [heads, H]
        w_out = jax.nn.softmax(params["unify_output_heads_w"], axis=1)[0, :, 0]  # [heads]
    else:
        w_in = jnp.ones((1, H), f32)
        w_out = jnp.ones((1,), f32)

    # -- fold both head-mergers into hyper_enemy layer-2 columns --
    W2e, b2e = params["hyper_enemy_w2"], params["hyper_enemy_b2"]
    n_fc1 = d_en * H * heads
    w_fc1 = jnp.einsum("xkhi,hi->xki",
                       W2e[:, :n_fc1].reshape(hyp, d_en, heads, H), w_in).reshape(hyp, d_en * H)
    b_fc1 = jnp.einsum("khi,hi->ki",
                       b2e[:n_fc1].reshape(d_en, heads, H), w_in).reshape(d_en * H)
    w_att = jnp.einsum("xih,h->xi",
                       W2e[:, n_fc1:n_fc1 + H * heads].reshape(hyp, H, heads), w_out)
    b_att = jnp.einsum("ih,h->i",
                       b2e[n_fc1:n_fc1 + H * heads].reshape(H, heads), w_out)
    w_attb = W2e[:, n_fc1 + H * heads:] @ w_out
    b_attb = b2e[n_fc1 + H * heads:] @ w_out
    he_w2 = jnp.concatenate([w_fc1, w_att, w_attb[:, None]], axis=1)             # [hyp, d_en*H+H+1]
    he_b2 = jnp.concatenate([b_fc1, b_att, b_attb[None]], axis=0)[None, :]

    # -- fold input head-merger into hyper_ally layer-2 columns --
    W2a, b2a = params["hyper_ally_w2"], params["hyper_ally_b2"]
    ha_w2 = jnp.einsum("xkhi,hi->xki",
                       W2a.reshape(hyp, d_al, heads, H), w_in).reshape(hyp, d_al * H)
    ha_b2 = jnp.einsum("khi,hi->ki",
                       b2a.reshape(d_al, heads, H), w_in).reshape(d_al * H)[None, :]

    # -- combined fc1_own / fc1 projection (shared input: own features) --
    w_own = jnp.concatenate([params["fc1_own_w"], params["fc1_w"]], axis=1)       # [d_own, 2H]
    b_own = jnp.concatenate([params["fc1_own_b"], params["fc1_b"]])[None, :]

    # -- fc2_normal zero-padded into full n_actions lane width --
    fc2n_w = jnp.concatenate(
        [params["fc2_normal_w"], jnp.zeros((H, n_act - n_norm), f32)], axis=1)
    fc2n_b = jnp.concatenate(
        [params["fc2_normal_b"], jnp.zeros((n_act - n_norm,), f32)])[None, :]

    # -- 0/1 selector constants (replace in-kernel reshape/gather/concat) --
    arN = jnp.arange(N)
    s_en = (jnp.arange(NE)[None, :] // n_enemies == arN[:, None]).astype(f32)     # [N, NE]
    s_al = (jnp.arange(NA)[None, :] // n_allies == arN[:, None]).astype(f32)      # [N, NA]
    r_en = s_en.T                                                                 # [NE, N]
    g_att = (jnp.arange(n_act)[None, :] ==
             n_norm + jnp.arange(NE)[:, None] % n_enemies).astype(f32)            # [NE, n_act]
    rep_ag = (arN[:, None] % n_agents == jnp.arange(n_agents)[None, :]).astype(f32)  # [N, n_agents]

    # -- per-agent MLP constants --
    mlp_wflat = jnp.transpose(params["mlp_w"], (1, 0, 2)).reshape(H, n_agents * n_act)
    mlp_bd = (jnp.arange(n_agents * n_act)[None, :] // n_act ==
              jnp.arange(n_agents)[:, None]).astype(f32)                          # [n_agents, n_agents*n_act]
    mlp_g2 = (jnp.arange(n_act)[None, :] ==
              jnp.arange(n_agents * n_act)[:, None] % n_act).astype(f32)          # [n_agents*n_act, n_act]

    # -- agent id embedding, pre-gathered --
    if cfg["obs_agent_id"]:
        aid = params["agent_id_embedding"][agent_indices.reshape(-1)]
    else:
        aid = jnp.zeros((N, H), f32)
    # TODO(synk): obs_last_action embedding path not implemented (cfg uses False).
    # TODO(synk): map_type == 'MMM' rescue branch not implemented (cfg uses 'default').

    gc, gr = params["gru_cell"], params["gru"]

    args = [
        own_feats, aid, enemy_feats, ally_feats, hidden_state.reshape(N, H),
        w_own, b_own,
        params["hyper_enemy_w1"], params["hyper_enemy_b1"][None, :], he_w2, he_b2,
        params["hyper_ally_w1"], params["hyper_ally_b1"][None, :], ha_w2, ha_b2,
        s_en, s_al, r_en, g_att,
        gc["w_i"], gc["w_h"], gc["b_i"][None, :], gc["b_h"][None, :],
        fc2n_w, fc2n_b,
        gr["w_i"], gr["w_h"], gr["b_i"][None, :], gr["b_h"][None, :],
        params["enc_w1"], params["enc_b1"][None, :], params["enc_w2"], params["enc_b2"][None, :],
        params["fc3_w"], params["fc3_b"][None, :],
        mlp_wflat, mlp_bd, mlp_g2, params["mlp_b"], rep_ag,
    ]

    kernel = functools.partial(_fused_kernel, H=H, d_en=d_en, d_al=d_al, n_agents=n_agents)
    out_shape = (
        jax.ShapeDtypeStruct((N, n_act), f32),
        jax.ShapeDtypeStruct((N, H), f32),
        jax.ShapeDtypeStruct((N, n_act), f32),
        jax.ShapeDtypeStruct((N, n_act), f32),
    )
    q, hh, local_q, q_f = pl.pallas_call(
        kernel,
        out_shape=out_shape,
        grid=(1,),
        in_specs=[_full_spec(a.shape) for a in args],
        out_specs=tuple(_full_spec(s.shape) for s in out_shape),
        compiler_params=pltpu.CompilerParams(dimension_semantics=("arbitrary",)),
    )(*args)

    return (q.reshape(bs, n_agents, n_act),
            hh.reshape(bs, n_agents, H),
            local_q.reshape(bs, n_agents, n_act),
            q_f.reshape(bs, n_agents, n_act))


# ---------------------------------------------------------------------------
# Parameter init (mirrors the PyTorch module's layers)
# ---------------------------------------------------------------------------

def _init_linear(key, fan_in, fan_out):
    kw, kb = jax.random.split(key)
    bound = 1.0 / math.sqrt(fan_in)
    w = jax.random.uniform(kw, (fan_in, fan_out), jnp.float32, -bound, bound)
    b = jax.random.uniform(kb, (fan_out,), jnp.float32, -bound, bound)
    return w, b


def _init_gru(key, in_dim, hid):
    keys = jax.random.split(key, 4)
    bound = 1.0 / math.sqrt(hid)
    u = lambda k, s: jax.random.uniform(k, s, jnp.float32, -bound, bound)
    # gate order (r, z, n) along the 3H axis, matching torch GRUCell / nn.GRU
    return {"w_i": u(keys[0], (in_dim, 3 * hid)), "w_h": u(keys[1], (hid, 3 * hid)),
            "b_i": u(keys[2], (3 * hid,)), "b_h": u(keys[3], (3 * hid,))}


def init_params(key, cfg):
    H, heads = cfg["rnn_hidden_dim"], cfg["hpn_head_num"]
    d_own, d_en, d_al = cfg["own_feats_dim"], cfg["enemy_feats_dim"], cfg["ally_feats_dim"]
    hyp, n_act = cfg["hpn_hyper_dim"], cfg["n_actions"]
    keys = jax.random.split(key, 32)
    p = {}
    p["fc1_own_w"], p["fc1_own_b"] = _init_linear(keys[0], d_own, H)
    p["agent_id_embedding"] = 0.1 * jax.random.normal(keys[1], (cfg["n_agents"], H), jnp.float32)
    p["hyper_enemy_w1"], p["hyper_enemy_b1"] = _init_linear(keys[2], d_en, hyp)
    out_e = ((d_en + 1) * H + 1) * heads
    p["hyper_enemy_w2"], p["hyper_enemy_b2"] = _init_linear(keys[3], hyp, out_e)
    p["hyper_ally_w1"], p["hyper_ally_b1"] = _init_linear(keys[4], d_al, hyp)
    out_a = d_al * H * heads                                 # map_type != 'MMM'
    p["hyper_ally_w2"], p["hyper_ally_b2"] = _init_linear(keys[5], hyp, out_a)
    p["unify_input_heads_w"] = jnp.ones((1, heads, H), jnp.float32)
    p["unify_output_heads_w"] = jnp.ones((1, heads, 1), jnp.float32)
    p["gru_cell"] = _init_gru(keys[6], H, H)
    p["fc2_normal_w"], p["fc2_normal_b"] = _init_linear(keys[7], H, cfg["output_normal_actions"])
    p["fc1_w"], p["fc1_b"] = _init_linear(keys[8], d_own, H)
    p["gru"] = _init_gru(keys[9], H, H)
    p["fc2_w"], p["fc2_b"] = _init_linear(keys[10], H, n_act)  # defined in module, unused in forward
    p["fc3_w"], p["fc3_b"] = _init_linear(keys[11], H, n_act)
    mlp_ws, mlp_bs = [], []
    for i in range(cfg["n_agents"]):
        w, b = _init_linear(keys[12 + i], H, n_act)
        mlp_ws.append(w)
        mlp_bs.append(b)
    p["mlp_w"] = jnp.stack(mlp_ws)                           # [n_agents, H, n_actions]
    p["mlp_b"] = jnp.stack(mlp_bs)                           # [n_agents, n_actions]
    # TODO(synk): `Encoder` class is not defined in the reference source; approximated
    # as a deterministic 2-layer MLP: H -> predict_net_dim -> H.
    p["enc_w1"], p["enc_b1"] = _init_linear(keys[20], H, cfg["predict_net_dim"])
    p["enc_w2"], p["enc_b2"] = _init_linear(keys[21], cfg["predict_net_dim"], H)
    return p


# ---------------------------------------------------------------------------
# Pure-JAX reference (un-fused, literal transcription of the PyTorch forward)
# ---------------------------------------------------------------------------

def _reference_forward(params, cfg, own_feats, enemy_feats, ally_feats,
                       agent_indices, hidden_state):
    n_agents, n_enemies, n_allies = cfg["n_agents"], cfg["n_enemies"], cfg["n_allies"]
    H, heads = cfg["rnn_hidden_dim"], cfg["hpn_head_num"]
    d_en, d_al = cfg["enemy_feats_dim"], cfg["ally_feats_dim"]
    N = own_feats.shape[0]
    bs = N // n_agents

    def lin(x, w, b):
        return x @ w + b

    def gru(x, h, p):
        gi = x @ p["w_i"] + p["b_i"]
        gh = h @ p["w_h"] + p["b_h"]
        r = jax.nn.sigmoid(gi[:, :H] + gh[:, :H])
        z = jax.nn.sigmoid(gi[:, H:2 * H] + gh[:, H:2 * H])
        n = jnp.tanh(gi[:, 2 * H:] + r * gh[:, 2 * H:])
        return (1 - z) * n + z * h

    def merger(w, x):
        return jnp.sum(jax.nn.softmax(w, axis=1) * x, axis=1)

    emb_own = lin(own_feats, params["fc1_own_w"], params["fc1_own_b"])
    if cfg["obs_agent_id"]:
        emb_own = emb_own + params["agent_id_embedding"][agent_indices.reshape(-1)]

    he = lin(jnp.maximum(lin(enemy_feats, params["hyper_enemy_w1"], params["hyper_enemy_b1"]), 0),
             params["hyper_enemy_w2"], params["hyper_enemy_b2"])
    fc1_w_enemy = he[:, :-(H + 1) * heads].reshape(-1, d_en, H * heads)
    emb_en = jnp.einsum("nk,nkj->nj", enemy_feats, fc1_w_enemy).reshape(
        N, n_enemies, heads, H).sum(1)

    ha = lin(jnp.maximum(lin(ally_feats, params["hyper_ally_w1"], params["hyper_ally_b1"]), 0),
             params["hyper_ally_w2"], params["hyper_ally_b2"])
    fc1_w_ally = ha.reshape(-1, d_al, H * heads)
    emb_al = jnp.einsum("nk,nkj->nj", ally_feats, fc1_w_ally).reshape(
        N, n_allies, heads, H).sum(1)

    emb = emb_own + merger(params["unify_input_heads_w"], emb_en + emb_al)
    x = jnp.maximum(emb, 0)
    h_in = hidden_state.reshape(-1, H)
    hh = gru(x, h_in, params["gru_cell"])
    q_normal = lin(hh, params["fc2_normal_w"], params["fc2_normal_b"]).reshape(bs, n_agents, -1)

    fc2_w_attack = he[:, -(H + 1) * heads:-heads].reshape(N, n_enemies, H, heads)
    fc2_w_attack = jnp.transpose(fc2_w_attack, (0, 2, 1, 3)).reshape(N, H, n_enemies * heads)
    fc2_b_attack = he[:, -heads:].reshape(N, n_enemies * heads)
    q_attacks = (jnp.einsum("nh,nhj->nj", hh, fc2_w_attack) + fc2_b_attack
                 ).reshape(N * n_enemies, heads, 1)
    q_attack = merger(params["unify_output_heads_w"], q_attacks).reshape(bs, n_agents, n_enemies)
    q = jnp.concatenate([q_normal, q_attack], axis=-1)

    x2 = jnp.maximum(lin(own_feats, params["fc1_w"], params["fc1_b"]), 0)
    g_out = gru(x2, h_in, params["gru"])
    z = lin(jnp.maximum(lin(g_out, params["enc_w1"], params["enc_b1"]), 0),
            params["enc_w2"], params["enc_b2"])
    local_q = jnp.stack(
        [g_out[a] @ params["mlp_w"][a] + params["mlp_b"][a] for a in range(n_agents)], axis=0)
    local_q = jnp.broadcast_to(local_q[None], q.shape)
    q_f = lin(z, params["fc3_w"], params["fc3_b"]).reshape(q.shape)
    q = q + local_q + q_f
    return q, hh.reshape(bs, n_agents, H), local_q, q_f


# ---------------------------------------------------------------------------
# Main
# ---------------------------------------------------------------------------

if __name__ == "__main__":
    cfg = dict(
        n_agents=3, n_allies=2, n_enemies=4,
        output_normal_actions=6, n_actions=6 + 4,      # normal + attack(enemies)
        rnn_hidden_dim=32, hpn_head_num=2, hpn_hyper_dim=16, predict_net_dim=16,
        own_feats_dim=6, enemy_feats_dim=5, ally_feats_dim=5,
        obs_agent_id=True, obs_last_action=False, map_type="default",
    )
    bs = 2
    N = bs * cfg["n_agents"]

    root = jax.random.PRNGKey(0)
    kp, kx1, kx2, kx3 = jax.random.split(root, 4)
    params = init_params(kp, cfg)

    own_feats = jax.random.normal(kx1, (N, cfg["own_feats_dim"]), jnp.float32)
    enemy_feats = jax.random.normal(kx2, (N * cfg["n_enemies"], cfg["enemy_feats_dim"]), jnp.float32)
    ally_feats = jax.random.normal(kx3, (N * cfg["n_allies"], cfg["ally_feats_dim"]), jnp.float32)
    agent_indices = jnp.tile(jnp.arange(cfg["n_agents"], dtype=jnp.int32)[None], (bs, 1))
    hidden_state = jnp.zeros((N, cfg["rnn_hidden_dim"]), jnp.float32)

    fwd = jax.jit(functools.partial(fox_hpns_forward, params, cfg))
    q, hh, local_q, q_f = fwd(own_feats, enemy_feats, ally_feats, agent_indices, hidden_state)
    jax.block_until_ready((q, hh, local_q, q_f))

    # shape checks
    assert q.shape == (bs, cfg["n_agents"], cfg["n_actions"])
    assert hh.shape == (bs, cfg["n_agents"], cfg["rnn_hidden_dim"])
    assert local_q.shape == q.shape and q_f.shape == q.shape

    # numerical check against the un-fused pure-JAX transcription of the module
    q_r, hh_r, lq_r, qf_r = _reference_forward(
        params, cfg, own_feats, enemy_feats, ally_feats, agent_indices, hidden_state)
    assert jnp.allclose(q, q_r, atol=2e-3, rtol=2e-3)
    assert jnp.allclose(hh, hh_r, atol=2e-3, rtol=2e-3)
    assert jnp.allclose(local_q, lq_r, atol=2e-3, rtol=2e-3)
    assert jnp.allclose(q_f, qf_r, atol=2e-3, rtol=2e-3)

    print("KERNEL_OK")
</pallas_src>

<mosaic_0001>
module attributes {stable_mosaic.version = 11 : i64} {
  func.func @_fused_kernel(%arg0: i32, %arg1: memref<6x6xf32, #tpu.memory_space<vmem>>, %arg2: memref<6x32xf32, #tpu.memory_space<vmem>>, %arg3: memref<24x5xf32, #tpu.memory_space<vmem>>, %arg4: memref<12x5xf32, #tpu.memory_space<vmem>>, %arg5: memref<6x32xf32, #tpu.memory_space<vmem>>, %arg6: memref<6x64xf32, #tpu.memory_space<vmem>>, %arg7: memref<1x64xf32, #tpu.memory_space<vmem>>, %arg8: memref<5x16xf32, #tpu.memory_space<vmem>>, %arg9: memref<1x16xf32, #tpu.memory_space<vmem>>, %arg10: memref<16x193xf32, #tpu.memory_space<vmem>>, %arg11: memref<1x193xf32, #tpu.memory_space<vmem>>, %arg12: memref<5x16xf32, #tpu.memory_space<vmem>>, %arg13: memref<1x16xf32, #tpu.memory_space<vmem>>, %arg14: memref<16x160xf32, #tpu.memory_space<vmem>>, %arg15: memref<1x160xf32, #tpu.memory_space<vmem>>, %arg16: memref<6x24xf32, #tpu.memory_space<vmem>>, %arg17: memref<6x12xf32, #tpu.memory_space<vmem>>, %arg18: memref<24x6xf32, #tpu.memory_space<vmem>>, %arg19: memref<24x10xf32, #tpu.memory_space<vmem>>, %arg20: memref<32x96xf32, #tpu.memory_space<vmem>>, %arg21: memref<32x96xf32, #tpu.memory_space<vmem>>, %arg22: memref<1x96xf32, #tpu.memory_space<vmem>>, %arg23: memref<1x96xf32, #tpu.memory_space<vmem>>, %arg24: memref<32x10xf32, #tpu.memory_space<vmem>>, %arg25: memref<1x10xf32, #tpu.memory_space<vmem>>, %arg26: memref<32x96xf32, #tpu.memory_space<vmem>>, %arg27: memref<32x96xf32, #tpu.memory_space<vmem>>, %arg28: memref<1x96xf32, #tpu.memory_space<vmem>>, %arg29: memref<1x96xf32, #tpu.memory_space<vmem>>, %arg30: memref<32x16xf32, #tpu.memory_space<vmem>>, %arg31: memref<1x16xf32, #tpu.memory_space<vmem>>, %arg32: memref<16x32xf32, #tpu.memory_space<vmem>>, %arg33: memref<1x32xf32, #tpu.memory_space<vmem>>, %arg34: memref<32x10xf32, #tpu.memory_space<vmem>>, %arg35: memref<1x10xf32, #tpu.memory_space<vmem>>, %arg36: memref<32x30xf32, #tpu.memory_space<vmem>>, %arg37: memref<3x30xf32, #tpu.memory_space<vmem>>, %arg38: memref<30x10xf32, #tpu.memory_space<vmem>>, %arg39: memref<3x10xf32, #tpu.memory_space<vmem>>, %arg40: memref<6x3xf32, #tpu.memory_space<vmem>>, %arg41: memref<6x10xf32, #tpu.memory_space<vmem>>, %arg42: memref<6x32xf32, #tpu.memory_space<vmem>>, %arg43: memref<6x10xf32, #tpu.memory_space<vmem>>, %arg44: memref<6x10xf32, #tpu.memory_space<vmem>>) attributes {dimension_semantics = [#tpu.dimension_semantics<arbitrary>], iteration_bounds = array<i64: 1>, scalar_prefetch = 0 : i64, scratch_operands = 0 : i64, tpu.core_type = #tpu.core_type<tc>, window_params = [{pipeline_mode = #tpu.pipeline_mode<synchronous>, transform_indices = @transform_0, window_bounds = array<i64: 6, 6>}, {pipeline_mode = #tpu.pipeline_mode<synchronous>, transform_indices = @transform_1, window_bounds = array<i64: 6, 32>}, {pipeline_mode = #tpu.pipeline_mode<synchronous>, transform_indices = @transform_2, window_bounds = array<i64: 24, 5>}, {pipeline_mode = #tpu.pipeline_mode<synchronous>, transform_indices = @transform_3, window_bounds = array<i64: 12, 5>}, {pipeline_mode = #tpu.pipeline_mode<synchronous>, transform_indices = @transform_4, window_bounds = array<i64: 6, 32>}, {pipeline_mode = #tpu.pipeline_mode<synchronous>, transform_indices = @transform_5, window_bounds = array<i64: 6, 64>}, {pipeline_mode = #tpu.pipeline_mode<synchronous>, transform_indices = @transform_6, window_bounds = array<i64: 1, 64>}, {pipeline_mode = #tpu.pipeline_mode<synchronous>, transform_indices = @transform_7, window_bounds = array<i64: 5, 16>}, {pipeline_mode = #tpu.pipeline_mode<synchronous>, transform_indices = @transform_8, window_bounds = array<i64: 1, 16>}, {pipeline_mode = #tpu.pipeline_mode<synchronous>, transform_indices = @transform_9, window_bounds = array<i64: 16, 193>}, {pipeline_mode = #tpu.pipeline_mode<synchronous>, transform_indices = @transform_10, window_bounds = array<i64: 1, 193>}, {pipeline_mode = #tpu.pipeline_mode<synchronous>, transform_indices = @transform_11, window_bounds = array<i64: 5, 16>}, {pipeline_mode = #tpu.pipeline_mode<synchronous>, transform_indices = @transform_12, window_bounds = array<i64: 1, 16>}, {pipeline_mode = #tpu.pipeline_mode<synchronous>, transform_indices = @transform_13, window_bounds = array<i64: 16, 160>}, {pipeline_mode = #tpu.pipeline_mode<synchronous>, transform_indices = @transform_14, window_bounds = array<i64: 1, 160>}, {pipeline_mode = #tpu.pipeline_mode<synchronous>, transform_indices = @transform_15, window_bounds = array<i64: 6, 24>}, {pipeline_mode = #tpu.pipeline_mode<synchronous>, transform_indices = @transform_16, window_bounds = array<i64: 6, 12>}, {pipeline_mode = #tpu.pipeline_mode<synchronous>, transform_indices = @transform_17, window_bounds = array<i64: 24, 6>}, {pipeline_mode = #tpu.pipeline_mode<synchronous>, transform_indices = @transform_18, window_bounds = array<i64: 24, 10>}, {pipeline_mode = #tpu.pipeline_mode<synchronous>, transform_indices = @transform_19, window_bounds = array<i64: 32, 96>}, {pipeline_mode = #tpu.pipeline_mode<synchronous>, transform_indices = @transform_20, window_bounds = array<i64: 32, 96>}, {pipeline_mode = #tpu.pipeline_mode<synchronous>, transform_indices = @transform_21, window_bounds = array<i64: 1, 96>}, {pipeline_mode = #tpu.pipeline_mode<synchronous>, transform_indices = @transform_22, window_bounds = array<i64: 1, 96>}, {pipeline_mode = #tpu.pipeline_mode<synchronous>, transform_indices = @transform_23, window_bounds = array<i64: 32, 10>}, {pipeline_mode = #tpu.pipeline_mode<synchronous>, transform_indices = @transform_24, window_bounds = array<i64: 1, 10>}, {pipeline_mode = #tpu.pipeline_mode<synchronous>, transform_indices = @transform_25, window_bounds = array<i64: 32, 96>}, {pipeline_mode = #tpu.pipeline_mode<synchronous>, transform_indices = @transform_26, window_bounds = array<i64: 32, 96>}, {pipeline_mode = #tpu.pipeline_mode<synchronous>, transform_indices = @transform_27, window_bounds = array<i64: 1, 96>}, {pipeline_mode = #tpu.pipeline_mode<synchronous>, transform_indices = @transform_28, window_bounds = array<i64: 1, 96>}, {pipeline_mode = #tpu.pipeline_mode<synchronous>, transform_indices = @transform_29, window_bounds = array<i64: 32, 16>}, {pipeline_mode = #tpu.pipeline_mode<synchronous>, transform_indices = @transform_30, window_bounds = array<i64: 1, 16>}, {pipeline_mode = #tpu.pipeline_mode<synchronous>, transform_indices = @transform_31, window_bounds = array<i64: 16, 32>}, {pipeline_mode = #tpu.pipeline_mode<synchronous>, transform_indices = @transform_32, window_bounds = array<i64: 1, 32>}, {pipeline_mode = #tpu.pipeline_mode<synchronous>, transform_indices = @transform_33, window_bounds = array<i64: 32, 10>}, {pipeline_mode = #tpu.pipeline_mode<synchronous>, transform_indices = @transform_34, window_bounds = array<i64: 1, 10>}, {pipeline_mode = #tpu.pipeline_mode<synchronous>, transform_indices = @transform_35, window_bounds = array<i64: 32, 30>}, {pipeline_mode = #tpu.pipeline_mode<synchronous>, transform_indices = @transform_36, window_bounds = array<i64: 3, 30>}, {pipeline_mode = #tpu.pipeline_mode<synchronous>, transform_indices = @transform_37, window_bounds = array<i64: 30, 10>}, {pipeline_mode = #tpu.pipeline_mode<synchronous>, transform_indices = @transform_38, window_bounds = array<i64: 3, 10>}, {pipeline_mode = #tpu.pipeline_mode<synchronous>, transform_indices = @transform_39, window_bounds = array<i64: 6, 3>}, {pipeline_mode = #tpu.pipeline_mode<synchronous>, transform_indices = @transform_40, window_bounds = array<i64: 6, 10>}, {pipeline_mode = #tpu.pipeline_mode<synchronous>, transform_indices = @transform_41, window_bounds = array<i64: 6, 32>}, {pipeline_mode = #tpu.pipeline_mode<synchronous>, transform_indices = @transform_42, window_bounds = array<i64: 6, 10>}, {pipeline_mode = #tpu.pipeline_mode<synchronous>, transform_indices = @transform_43, window_bounds = array<i64: 6, 10>}]} {
    %c0 = arith.constant 0 : index
    %c0_0 = arith.constant 0 : index
    %0 = vector.load %arg1[%c0, %c0_0] : memref<6x6xf32, #tpu.memory_space<vmem>>, vector<6x6xf32>
    %c0_1 = arith.constant 0 : index
    %c0_2 = arith.constant 0 : index
    %1 = vector.load %arg3[%c0_1, %c0_2] : memref<24x5xf32, #tpu.memory_space<vmem>>, vector<24x5xf32>
    %c0_3 = arith.constant 0 : index
    %c0_4 = arith.constant 0 : index
    %2 = vector.load %arg4[%c0_3, %c0_4] : memref<12x5xf32, #tpu.memory_space<vmem>>, vector<12x5xf32>
    %c0_5 = arith.constant 0 : index
    %c0_6 = arith.constant 0 : index
    %3 = vector.load %arg5[%c0_5, %c0_6] : memref<6x32xf32, #tpu.memory_space<vmem>>, vector<6x32xf32>
    %c0_7 = arith.constant 0 : index
    %c0_8 = arith.constant 0 : index
    %4 = vector.load %arg6[%c0_7, %c0_8] : memref<6x64xf32, #tpu.memory_space<vmem>>, vector<6x64xf32>
    %cst = arith.constant dense<0.000000e+00> : vector<6x64xf32>
    %5 = tpu.matmul %0, %4, %cst {dimension_numbers = #tpu.dot_dimension_numbers<[1], [0], [0], [1], [0, 0, 1, 1], [], []>} : vector<6x6xf32>, vector<6x64xf32>, vector<6x64xf32> -> vector<6x64xf32>
    %c0_9 = arith.constant 0 : index
    %c0_10 = arith.constant 0 : index
    %6 = vector.load %arg7[%c0_9, %c0_10] : memref<1x64xf32, #tpu.memory_space<vmem>>, vector<1x64xf32>
    %7 = vector.broadcast %6 : vector<1x64xf32> to vector<6x64xf32>
    %8 = arith.addf %5, %7 : vector<6x64xf32>
    %9 = vector.extract_strided_slice %8 {offsets = [0, 0], sizes = [6, 32], strides = [1, 1]} : vector<6x64xf32> to vector<6x32xf32>
    %c0_11 = arith.constant 0 : index
    %c0_12 = arith.constant 0 : index
    %10 = vector.load %arg2[%c0_11, %c0_12] : memref<6x32xf32, #tpu.memory_space<vmem>>, vector<6x32xf32>
    %11 = arith.addf %9, %10 : vector<6x32xf32>
    %12 = vector.extract_strided_slice %8 {offsets = [0, 32], sizes = [6, 32], strides = [1, 1]} : vector<6x64xf32> to vector<6x32xf32>
    %cst_13 = arith.constant 0.000000e+00 : f32
    %13 = vector.broadcast %cst_13 : f32 to vector<6x32xf32>
    %14 = arith.maximumf %12, %13 : vector<6x32xf32>
    %c0_14 = arith.constant 0 : index
    %c0_15 = arith.constant 0 : index
    %15 = vector.load %arg8[%c0_14, %c0_15] : memref<5x16xf32, #tpu.memory_space<vmem>>, vector<5x16xf32>
    %cst_16 = arith.constant dense<0.000000e+00> : vector<24x16xf32>
    %16 = tpu.matmul %1, %15, %cst_16 {dimension_numbers = #tpu.dot_dimension_numbers<[1], [0], [0], [1], [0, 0, 1, 1], [], []>} : vector<24x5xf32>, vector<5x16xf32>, vector<24x16xf32> -> vector<24x16xf32>
    %c0_17 = arith.constant 0 : index
    %c0_18 = arith.constant 0 : index
    %17 = vector.load %arg9[%c0_17, %c0_18] : memref<1x16xf32, #tpu.memory_space<vmem>>, vector<1x16xf32>
    %18 = vector.broadcast %17 : vector<1x16xf32> to vector<24x16xf32>
    %19 = arith.addf %16, %18 : vector<24x16xf32>
    %cst_19 = arith.constant 0.000000e+00 : f32
    %20 = vector.broadcast %cst_19 : f32 to vector<24x16xf32>
    %21 = arith.maximumf %19, %20 : vector<24x16xf32>
    %c0_20 = arith.constant 0 : index
    %c0_21 = arith.constant 0 : index
    %22 = vector.load %arg10[%c0_20, %c0_21] : memref<16x193xf32, #tpu.memory_space<vmem>>, vector<16x193xf32>
    %cst_22 = arith.constant dense<0.000000e+00> : vector<24x193xf32>
    %23 = tpu.matmul %21, %22, %cst_22 {dimension_numbers = #tpu.dot_dimension_numbers<[1], [0], [0], [1], [0, 0, 1, 1], [], []>} : vector<24x16xf32>, vector<16x193xf32>, vector<24x193xf32> -> vector<24x193xf32>
    %c0_23 = arith.constant 0 : index
    %c0_24 = arith.constant 0 : index
    %24 = vector.load %arg11[%c0_23, %c0_24] : memref<1x193xf32, #tpu.memory_space<vmem>>, vector<1x193xf32>
    %25 = vector.broadcast %24 : vector<1x193xf32> to vector<24x193xf32>
    %26 = arith.addf %23, %25 : vector<24x193xf32>
    %27 = vector.extract_strided_slice %1 {offsets = [0, 0], sizes = [24, 1], strides = [1, 1]} : vector<24x5xf32> to vector<24x1xf32>
    %28 = vector.extract_strided_slice %26 {offsets = [0, 0], sizes = [24, 32], strides = [1, 1]} : vector<24x193xf32> to vector<24x32xf32>
    %29 = vector.broadcast %27 : vector<24x1xf32> to vector<24x32xf32>
    %30 = arith.mulf %29, %28 : vector<24x32xf32>
    %31 = vector.extract_strided_slice %1 {offsets = [0, 1], sizes = [24, 1], strides = [1, 1]} : vector<24x5xf32> to vector<24x1xf32>
    %32 = vector.extract_strided_slice %26 {offsets = [0, 32], sizes = [24, 32], strides = [1, 1]} : vector<24x193xf32> to vector<24x32xf32>
    %33 = vector.broadcast %31 : vector<24x1xf32> to vector<24x32xf32>
    %34 = arith.mulf %33, %32 : vector<24x32xf32>
    %35 = arith.addf %30, %34 : vector<24x32xf32>
    %36 = vector.extract_strided_slice %1 {offsets = [0, 2], sizes = [24, 1], strides = [1, 1]} : vector<24x5xf32> to vector<24x1xf32>
    %37 = vector.extract_strided_slice %26 {offsets = [0, 64], sizes = [24, 32], strides = [1, 1]} : vector<24x193xf32> to vector<24x32xf32>
    %38 = vector.broadcast %36 : vector<24x1xf32> to vector<24x32xf32>
    %39 = arith.mulf %38, %37 : vector<24x32xf32>
    %40 = arith.addf %35, %39 : vector<24x32xf32>
    %41 = vector.extract_strided_slice %1 {offsets = [0, 3], sizes = [24, 1], strides = [1, 1]} : vector<24x5xf32> to vector<24x1xf32>
    %42 = vector.extract_strided_slice %26 {offsets = [0, 96], sizes = [24, 32], strides = [1, 1]} : vector<24x193xf32> to vector<24x32xf32>
    %43 = vector.broadcast %41 : vector<24x1xf32> to vector<24x32xf32>
    %44 = arith.mulf %43, %42 : vector<24x32xf32>
    %45 = arith.addf %40, %44 : vector<24x32xf32>
    %46 = vector.extract_strided_slice %1 {offsets = [0, 4], sizes = [24, 1], strides = [1, 1]} : vector<24x5xf32> to vector<24x1xf32>
    %47 = vector.extract_strided_slice %26 {offsets = [0, 128], sizes = [24, 32], strides = [1, 1]} : vector<24x193xf32> to vector<24x32xf32>
    %48 = vector.broadcast %46 : vector<24x1xf32> to vector<24x32xf32>
    %49 = arith.mulf %48, %47 : vector<24x32xf32>
    %50 = arith.addf %45, %49 : vector<24x32xf32>
    %c0_25 = arith.constant 0 : index
    %c0_26 = arith.constant 0 : index
    %51 = vector.load %arg16[%c0_25, %c0_26] : memref<6x24xf32, #tpu.memory_space<vmem>>, vector<6x24xf32>
    %cst_27 = arith.constant dense<0.000000e+00> : vector<6x32xf32>
    %52 = tpu.matmul %51, %50, %cst_27 {dimension_numbers = #tpu.dot_dimension_numbers<[1], [0], [0], [1], [0, 0, 1, 1], [], []>} : vector<6x24xf32>, vector<24x32xf32>, vector<6x32xf32> -> vector<6x32xf32>
    %c0_28 = arith.constant 0 : index
    %c0_29 = arith.constant 0 : index
    %53 = vector.load %arg12[%c0_28, %c0_29] : memref<5x16xf32, #tpu.memory_space<vmem>>, vector<5x16xf32>
    %cst_30 = arith.constant dense<0.000000e+00> : vector<12x16xf32>
    %54 = tpu.matmul %2, %53, %cst_30 {dimension_numbers = #tpu.dot_dimension_numbers<[1], [0], [0], [1], [0, 0, 1, 1], [], []>} : vector<12x5xf32>, vector<5x16xf32>, vector<12x16xf32> -> vector<12x16xf32>
    %c0_31 = arith.constant 0 : index
    %c0_32 = arith.constant 0 : index
    %55 = vector.load %arg13[%c0_31, %c0_32] : memref<1x16xf32, #tpu.memory_space<vmem>>, vector<1x16xf32>
    %56 = vector.broadcast %55 : vector<1x16xf32> to vector<12x16xf32>
    %57 = arith.addf %54, %56 : vector<12x16xf32>
    %cst_33 = arith.constant 0.000000e+00 : f32
    %58 = vector.broadcast %cst_33 : f32 to vector<12x16xf32>
    %59 = arith.maximumf %57, %58 : vector<12x16xf32>
    %c0_34 = arith.constant 0 : index
    %c0_35 = arith.constant 0 : index
    %60 = vector.load %arg14[%c0_34, %c0_35] : memref<16x160xf32, #tpu.memory_space<vmem>>, vector<16x160xf32>
    %cst_36 = arith.constant dense<0.000000e+00> : vector<12x160xf32>
    %61 = tpu.matmul %59, %60, %cst_36 {dimension_numbers = #tpu.dot_dimension_numbers<[1], [0], [0], [1], [0, 0, 1, 1], [], []>} : vector<12x16xf32>, vector<16x160xf32>, vector<12x160xf32> -> vector<12x160xf32>
    %c0_37 = arith.constant 0 : index
    %c0_38 = arith.constant 0 : index
    %62 = vector.load %arg15[%c0_37, %c0_38] : memref<1x160xf32, #tpu.memory_space<vmem>>, vector<1x160xf32>
    %63 = vector.broadcast %62 : vector<1x160xf32> to vector<12x160xf32>
    %64 = arith.addf %61, %63 : vector<12x160xf32>
    %65 = vector.extract_strided_slice %2 {offsets = [0, 0], sizes = [12, 1], strides = [1, 1]} : vector<12x5xf32> to vector<12x1xf32>
    %66 = vector.extract_strided_slice %64 {offsets = [0, 0], sizes = [12, 32], strides = [1, 1]} : vector<12x160xf32> to vector<12x32xf32>
    %67 = vector.broadcast %65 : vector<12x1xf32> to vector<12x32xf32>
    %68 = arith.mulf %67, %66 : vector<12x32xf32>
    %69 = vector.extract_strided_slice %2 {offsets = [0, 1], sizes = [12, 1], strides = [1, 1]} : vector<12x5xf32> to vector<12x1xf32>
    %70 = vector.extract_strided_slice %64 {offsets = [0, 32], sizes = [12, 32], strides = [1, 1]} : vector<12x160xf32> to vector<12x32xf32>
    %71 = vector.broadcast %69 : vector<12x1xf32> to vector<12x32xf32>
    %72 = arith.mulf %71, %70 : vector<12x32xf32>
    %73 = arith.addf %68, %72 : vector<12x32xf32>
    %74 = vector.extract_strided_slice %2 {offsets = [0, 2], sizes = [12, 1], strides = [1, 1]} : vector<12x5xf32> to vector<12x1xf32>
    %75 = vector.extract_strided_slice %64 {offsets = [0, 64], sizes = [12, 32], strides = [1, 1]} : vector<12x160xf32> to vector<12x32xf32>
    %76 = vector.broadcast %74 : vector<12x1xf32> to vector<12x32xf32>
    %77 = arith.mulf %76, %75 : vector<12x32xf32>
    %78 = arith.addf %73, %77 : vector<12x32xf32>
    %79 = vector.extract_strided_slice %2 {offsets = [0, 3], sizes = [12, 1], strides = [1, 1]} : vector<12x5xf32> to vector<12x1xf32>
    %80 = vector.extract_strided_slice %64 {offsets = [0, 96], sizes = [12, 32], strides = [1, 1]} : vector<12x160xf32> to vector<12x32xf32>
    %81 = vector.broadcast %79 : vector<12x1xf32> to vector<12x32xf32>
    %82 = arith.mulf %81, %80 : vector<12x32xf32>
    %83 = arith.addf %78, %82 : vector<12x32xf32>
    %84 = vector.extract_strided_slice %2 {offsets = [0, 4], sizes = [12, 1], strides = [1, 1]} : vector<12x5xf32> to vector<12x1xf32>
    %85 = vector.extract_strided_slice %64 {offsets = [0, 128], sizes = [12, 32], strides = [1, 1]} : vector<12x160xf32> to vector<12x32xf32>
    %86 = vector.broadcast %84 : vector<12x1xf32> to vector<12x32xf32>
    %87 = arith.mulf %86, %85 : vector<12x32xf32>
    %88 = arith.addf %83, %87 : vector<12x32xf32>
    %c0_39 = arith.constant 0 : index
    %c0_40 = arith.constant 0 : index
    %89 = vector.load %arg17[%c0_39, %c0_40] : memref<6x12xf32, #tpu.memory_space<vmem>>, vector<6x12xf32>
    %cst_41 = arith.constant dense<0.000000e+00> : vector<6x32xf32>
    %90 = tpu.matmul %89, %88, %cst_41 {dimension_numbers = #tpu.dot_dimension_numbers<[1], [0], [0], [1], [0, 0, 1, 1], [], []>} : vector<6x12xf32>, vector<12x32xf32>, vector<6x32xf32> -> vector<6x32xf32>
    %91 = arith.addf %11, %52 : vector<6x32xf32>
    %92 = arith.addf %91, %90 : vector<6x32xf32>
    %cst_42 = arith.constant 0.000000e+00 : f32
    %93 = vector.broadcast %cst_42 : f32 to vector<6x32xf32>
    %94 = arith.maximumf %92, %93 : vector<6x32xf32>
    %c0_43 = arith.constant 0 : index
    %c0_44 = arith.constant 0 : index
    %95 = vector.load %arg20[%c0_43, %c0_44] : memref<32x96xf32, #tpu.memory_space<vmem>>, vector<32x96xf32>
    %cst_45 = arith.constant dense<0.000000e+00> : vector<6x96xf32>
    %96 = tpu.matmul %94, %95, %cst_45 {dimension_numbers = #tpu.dot_dimension_numbers<[1], [0], [0], [1], [0, 0, 1, 1], [], []>} : vector<6x32xf32>, vector<32x96xf32>, vector<6x96xf32> -> vector<6x96xf32>
    %c0_46 = arith.constant 0 : index
    %c0_47 = arith.constant 0 : index
    %97 = vector.load %arg22[%c0_46, %c0_47] : memref<1x96xf32, #tpu.memory_space<vmem>>, vector<1x96xf32>
    %98 = vector.broadcast %97 : vector<1x96xf32> to vector<6x96xf32>
    %99 = arith.addf %96, %98 : vector<6x96xf32>
    %c0_48 = arith.constant 0 : index
    %c0_49 = arith.constant 0 : index
    %100 = vector.load %arg21[%c0_48, %c0_49] : memref<32x96xf32, #tpu.memory_space<vmem>>, vector<32x96xf32>
    %cst_50 = arith.constant dense<0.000000e+00> : vector<6x96xf32>
    %101 = tpu.matmul %3, %100, %cst_50 {dimension_numbers = #tpu.dot_dimension_numbers<[1], [0], [0], [1], [0, 0, 1, 1], [], []>} : vector<6x32xf32>, vector<32x96xf32>, vector<6x96xf32> -> vector<6x96xf32>
    %c0_51 = arith.constant 0 : index
    %c0_52 = arith.constant 0 : index
    %102 = vector.load %arg23[%c0_51, %c0_52] : memref<1x96xf32, #tpu.memory_space<vmem>>, vector<1x96xf32>
    %103 = vector.broadcast %102 : vector<1x96xf32> to vector<6x96xf32>
    %104 = arith.addf %101, %103 : vector<6x96xf32>
    %105 = vector.extract_strided_slice %99 {offsets = [0, 0], sizes = [6, 32], strides = [1, 1]} : vector<6x96xf32> to vector<6x32xf32>
    %106 = vector.extract_strided_slice %104 {offsets = [0, 0], sizes = [6, 32], strides = [1, 1]} : vector<6x96xf32> to vector<6x32xf32>
    %107 = arith.addf %105, %106 : vector<6x32xf32>
    %108 = arith.negf %107 : vector<6x32xf32>
    %109 = math.exp %108 : vector<6x32xf32>
    %cst_53 = arith.constant 1.000000e+00 : f32
    %110 = vector.broadcast %cst_53 : f32 to vector<6x32xf32>
    %111 = arith.addf %110, %109 : vector<6x32xf32>
    %112 = arith.divf %110, %111 : vector<6x32xf32>
    %113 = vector.extract_strided_slice %99 {offsets = [0, 32], sizes = [6, 32], strides = [1, 1]} : vector<6x96xf32> to vector<6x32xf32>
    %114 = vector.extract_strided_slice %104 {offsets = [0, 32], sizes = [6, 32], strides = [1, 1]} : vector<6x96xf32> to vector<6x32xf32>
    %115 = arith.addf %113, %114 : vector<6x32xf32>
    %116 = arith.negf %115 : vector<6x32xf32>
    %117 = math.exp %116 : vector<6x32xf32>
    %cst_54 = arith.constant 1.000000e+00 : f32
    %118 = vector.broadcast %cst_54 : f32 to vector<6x32xf32>
    %119 = arith.addf %118, %117 : vector<6x32xf32>
    %120 = arith.divf %118, %119 : vector<6x32xf32>
    %121 = vector.extract_strided_slice %99 {offsets = [0, 64], sizes = [6, 32], strides = [1, 1]} : vector<6x96xf32> to vector<6x32xf32>
    %122 = vector.extract_strided_slice %104 {offsets = [0, 64], sizes = [6, 32], strides = [1, 1]} : vector<6x96xf32> to vector<6x32xf32>
    %123 = arith.mulf %112, %122 : vector<6x32xf32>
    %124 = arith.addf %121, %123 : vector<6x32xf32>
    %125 = math.tanh %124 : vector<6x32xf32>
    %cst_55 = arith.constant 1.000000e+00 : f32
    %126 = vector.broadcast %cst_55 : f32 to vector<6x32xf32>
    %127 = arith.subf %126, %120 : vector<6x32xf32>
    %128 = arith.mulf %127, %125 : vector<6x32xf32>
    %129 = arith.mulf %120, %3 : vector<6x32xf32>
    %130 = arith.addf %128, %129 : vector<6x32xf32>
    %c0_56 = arith.constant 0 : index
    %c0_57 = arith.constant 0 : index
    %131 = vector.load %arg24[%c0_56, %c0_57] : memref<32x10xf32, #tpu.memory_space<vmem>>, vector<32x10xf32>
    %cst_58 = arith.constant dense<0.000000e+00> : vector<6x10xf32>
    %132 = tpu.matmul %130, %131, %cst_58 {dimension_numbers = #tpu.dot_dimension_numbers<[1], [0], [0], [1], [0, 0, 1, 1], [], []>} : vector<6x32xf32>, vector<32x10xf32>, vector<6x10xf32> -> vector<6x10xf32>
    %c0_59 = arith.constant 0 : index
    %c0_60 = arith.constant 0 : index
    %133 = vector.load %arg25[%c0_59, %c0_60] : memref<1x10xf32, #tpu.memory_space<vmem>>, vector<1x10xf32>
    %134 = vector.broadcast %133 : vector<1x10xf32> to vector<6x10xf32>
    %135 = arith.addf %132, %134 : vector<6x10xf32>
    %c0_61 = arith.constant 0 : index
    %c0_62 = arith.constant 0 : index
    %136 = vector.load %arg18[%c0_61, %c0_62] : memref<24x6xf32, #tpu.memory_space<vmem>>, vector<24x6xf32>
    %cst_63 = arith.constant dense<0.000000e+00> : vector<24x32xf32>
    %137 = tpu.matmul %136, %130, %cst_63 {dimension_numbers = #tpu.dot_dimension_numbers<[1], [0], [0], [1], [0, 0, 1, 1], [], []>} : vector<24x6xf32>, vector<6x32xf32>, vector<24x32xf32> -> vector<24x32xf32>
    %138 = vector.extract_strided_slice %26 {offsets = [0, 160], sizes = [24, 32], strides = [1, 1]} : vector<24x193xf32> to vector<24x32xf32>
    %139 = vector.extract_strided_slice %26 {offsets = [0, 192], sizes = [24, 1], strides = [1, 1]} : vector<24x193xf32> to vector<24x1xf32>
    %140 = arith.mulf %137, %138 : vector<24x32xf32>
    %cst_64 = arith.constant dense<0.000000e+00> : vector<24xf32>
    %141 = vector.multi_reduction <add>, %140, %cst_64 [1] : vector<24x32xf32> to vector<24xf32>
    %142 = vector.shape_cast %141 : vector<24xf32> to vector<24x1xf32>
    %143 = arith.addf %142, %139 : vector<24x1xf32>
    %c0_65 = arith.constant 0 : index
    %c0_66 = arith.constant 0 : index
    %144 = vector.load %arg16[%c0_65, %c0_66] : memref<6x24xf32, #tpu.memory_space<vmem>>, vector<6x24xf32>
    %c0_67 = arith.constant 0 : index
    %c0_68 = arith.constant 0 : index
    %145 = vector.load %arg19[%c0_67, %c0_68] : memref<24x10xf32, #tpu.memory_space<vmem>>, vector<24x10xf32>
    %146 = vector.broadcast %143 : vector<24x1xf32> to vector<24x10xf32>
    %147 = arith.mulf %146, %145 : vector<24x10xf32>
    %cst_69 = arith.constant dense<0.000000e+00> : vector<6x10xf32>
    %148 = tpu.matmul %144, %147, %cst_69 {dimension_numbers = #tpu.dot_dimension_numbers<[1], [0], [0], [1], [0, 0, 1, 1], [], []>} : vector<6x24xf32>, vector<24x10xf32>, vector<6x10xf32> -> vector<6x10xf32>
    %149 = arith.addf %135, %148 : vector<6x10xf32>
    %c0_70 = arith.constant 0 : index
    %c0_71 = arith.constant 0 : index
    %150 = vector.load %arg26[%c0_70, %c0_71] : memref<32x96xf32, #tpu.memory_space<vmem>>, vector<32x96xf32>
    %cst_72 = arith.constant dense<0.000000e+00> : vector<6x96xf32>
    %151 = tpu.matmul %14, %150, %cst_72 {dimension_numbers = #tpu.dot_dimension_numbers<[1], [0], [0], [1], [0, 0, 1, 1], [], []>} : vector<6x32xf32>, vector<32x96xf32>, vector<6x96xf32> -> vector<6x96xf32>
    %c0_73 = arith.constant 0 : index
    %c0_74 = arith.constant 0 : index
    %152 = vector.load %arg28[%c0_73, %c0_74] : memref<1x96xf32, #tpu.memory_space<vmem>>, vector<1x96xf32>
    %153 = vector.broadcast %152 : vector<1x96xf32> to vector<6x96xf32>
    %154 = arith.addf %151, %153 : vector<6x96xf32>
    %c0_75 = arith.constant 0 : index
    %c0_76 = arith.constant 0 : index
    %155 = vector.load %arg27[%c0_75, %c0_76] : memref<32x96xf32, #tpu.memory_space<vmem>>, vector<32x96xf32>
    %cst_77 = arith.constant dense<0.000000e+00> : vector<6x96xf32>
    %156 = tpu.matmul %3, %155, %cst_77 {dimension_numbers = #tpu.dot_dimension_numbers<[1], [0], [0], [1], [0, 0, 1, 1], [], []>} : vector<6x32xf32>, vector<32x96xf32>, vector<6x96xf32> -> vector<6x96xf32>
    %c0_78 = arith.constant 0 : index
    %c0_79 = arith.constant 0 : index
    %157 = vector.load %arg29[%c0_78, %c0_79] : memref<1x96xf32, #tpu.memory_space<vmem>>, vector<1x96xf32>
    %158 = vector.broadcast %157 : vector<1x96xf32> to vector<6x96xf32>
    %159 = arith.addf %156, %158 : vector<6x96xf32>
    %160 = vector.extract_strided_slice %154 {offsets = [0, 0], sizes = [6, 32], strides = [1, 1]} : vector<6x96xf32> to vector<6x32xf32>
    %161 = vector.extract_strided_slice %159 {offsets = [0, 0], sizes = [6, 32], strides = [1, 1]} : vector<6x96xf32> to vector<6x32xf32>
    %162 = arith.addf %160, %161 : vector<6x32xf32>
    %163 = arith.negf %162 : vector<6x32xf32>
    %164 = math.exp %163 : vector<6x32xf32>
    %cst_80 = arith.constant 1.000000e+00 : f32
    %165 = vector.broadcast %cst_80 : f32 to vector<6x32xf32>
    %166 = arith.addf %165, %164 : vector<6x32xf32>
    %167 = arith.divf %165, %166 : vector<6x32xf32>
    %168 = vector.extract_strided_slice %154 {offsets = [0, 32], sizes = [6, 32], strides = [1, 1]} : vector<6x96xf32> to vector<6x32xf32>
    %169 = vector.extract_strided_slice %159 {offsets = [0, 32], sizes = [6, 32], strides = [1, 1]} : vector<6x96xf32> to vector<6x32xf32>
    %170 = arith.addf %168, %169 : vector<6x32xf32>
    %171 = arith.negf %170 : vector<6x32xf32>
    %172 = math.exp %171 : vector<6x32xf32>
    %cst_81 = arith.constant 1.000000e+00 : f32
    %173 = vector.broadcast %cst_81 : f32 to vector<6x32xf32>
    %174 = arith.addf %173, %172 : vector<6x32xf32>
    %175 = arith.divf %173, %174 : vector<6x32xf32>
    %176 = vector.extract_strided_slice %154 {offsets = [0, 64], sizes = [6, 32], strides = [1, 1]} : vector<6x96xf32> to vector<6x32xf32>
    %177 = vector.extract_strided_slice %159 {offsets = [0, 64], sizes = [6, 32], strides = [1, 1]} : vector<6x96xf32> to vector<6x32xf32>
    %178 = arith.mulf %167, %177 : vector<6x32xf32>
    %179 = arith.addf %176, %178 : vector<6x32xf32>
    %180 = math.tanh %179 : vector<6x32xf32>
    %cst_82 = arith.constant 1.000000e+00 : f32
    %181 = vector.broadcast %cst_82 : f32 to vector<6x32xf32>
    %182 = arith.subf %181, %175 : vector<6x32xf32>
    %183 = arith.mulf %182, %180 : vector<6x32xf32>
    %184 = arith.mulf %175, %3 : vector<6x32xf32>
    %185 = arith.addf %183, %184 : vector<6x32xf32>
    %c0_83 = arith.constant 0 : index
    %c0_84 = arith.constant 0 : index
    %186 = vector.load %arg30[%c0_83, %c0_84] : memref<32x16xf32, #tpu.memory_space<vmem>>, vector<32x16xf32>
    %cst_85 = arith.constant dense<0.000000e+00> : vector<6x16xf32>
    %187 = tpu.matmul %185, %186, %cst_85 {dimension_numbers = #tpu.dot_dimension_numbers<[1], [0], [0], [1], [0, 0, 1, 1], [], []>} : vector<6x32xf32>, vector<32x16xf32>, vector<6x16xf32> -> vector<6x16xf32>
    %c0_86 = arith.constant 0 : index
    %c0_87 = arith.constant 0 : index
    %188 = vector.load %arg31[%c0_86, %c0_87] : memref<1x16xf32, #tpu.memory_space<vmem>>, vector<1x16xf32>
    %189 = vector.broadcast %188 : vector<1x16xf32> to vector<6x16xf32>
    %190 = arith.addf %187, %189 : vector<6x16xf32>
    %cst_88 = arith.constant 0.000000e+00 : f32
    %191 = vector.broadcast %cst_88 : f32 to vector<6x16xf32>
    %192 = arith.maximumf %190, %191 : vector<6x16xf32>
    %c0_89 = arith.constant 0 : index
    %c0_90 = arith.constant 0 : index
    %193 = vector.load %arg32[%c0_89, %c0_90] : memref<16x32xf32, #tpu.memory_space<vmem>>, vector<16x32xf32>
    %cst_91 = arith.constant dense<0.000000e+00> : vector<6x32xf32>
    %194 = tpu.matmul %192, %193, %cst_91 {dimension_numbers = #tpu.dot_dimension_numbers<[1], [0], [0], [1], [0, 0, 1, 1], [], []>} : vector<6x16xf32>, vector<16x32xf32>, vector<6x32xf32> -> vector<6x32xf32>
    %c0_92 = arith.constant 0 : index
    %c0_93 = arith.constant 0 : index
    %195 = vector.load %arg33[%c0_92, %c0_93] : memref<1x32xf32, #tpu.memory_space<vmem>>, vector<1x32xf32>
    %196 = vector.broadcast %195 : vector<1x32xf32> to vector<6x32xf32>
    %197 = arith.addf %194, %196 : vector<6x32xf32>
    %c0_94 = arith.constant 0 : index
    %c0_95 = arith.constant 0 : index
    %198 = vector.load %arg34[%c0_94, %c0_95] : memref<32x10xf32, #tpu.memory_space<vmem>>, vector<32x10xf32>
    %cst_96 = arith.constant dense<0.000000e+00> : vector<6x10xf32>
    %199 = tpu.matmul %197, %198, %cst_96 {dimension_numbers = #tpu.dot_dimension_numbers<[1], [0], [0], [1], [0, 0, 1, 1], [], []>} : vector<6x32xf32>, vector<32x10xf32>, vector<6x10xf32> -> vector<6x10xf32>
    %c0_97 = arith.constant 0 : index
    %c0_98 = arith.constant 0 : index
    %200 = vector.load %arg35[%c0_97, %c0_98] : memref<1x10xf32, #tpu.memory_space<vmem>>, vector<1x10xf32>
    %201 = vector.broadcast %200 : vector<1x10xf32> to vector<6x10xf32>
    %202 = arith.addf %199, %201 : vector<6x10xf32>
    %203 = vector.extract_strided_slice %185 {offsets = [0, 0], sizes = [3, 32], strides = [1, 1]} : vector<6x32xf32> to vector<3x32xf32>
    %c0_99 = arith.constant 0 : index
    %c0_100 = arith.constant 0 : index
    %204 = vector.load %arg36[%c0_99, %c0_100] : memref<32x30xf32, #tpu.memory_space<vmem>>, vector<32x30xf32>
    %cst_101 = arith.constant dense<0.000000e+00> : vector<3x30xf32>
    %205 = tpu.matmul %203, %204, %cst_101 {dimension_numbers = #tpu.dot_dimension_numbers<[1], [0], [0], [1], [0, 0, 1, 1], [], []>} : vector<3x32xf32>, vector<32x30xf32>, vector<3x30xf32> -> vector<3x30xf32>
    %c0_102 = arith.constant 0 : index
    %c0_103 = arith.constant 0 : index
    %206 = vector.load %arg37[%c0_102, %c0_103] : memref<3x30xf32, #tpu.memory_space<vmem>>, vector<3x30xf32>
    %207 = arith.mulf %205, %206 : vector<3x30xf32>
    %c0_104 = arith.constant 0 : index
    %c0_105 = arith.constant 0 : index
    %208 = vector.load %arg38[%c0_104, %c0_105] : memref<30x10xf32, #tpu.memory_space<vmem>>, vector<30x10xf32>
    %cst_106 = arith.constant dense<0.000000e+00> : vector<3x10xf32>
    %209 = tpu.matmul %207, %208, %cst_106 {dimension_numbers = #tpu.dot_dimension_numbers<[1], [0], [0], [1], [0, 0, 1, 1], [], []>} : vector<3x30xf32>, vector<30x10xf32>, vector<3x10xf32> -> vector<3x10xf32>
    %c0_107 = arith.constant 0 : index
    %c0_108 = arith.constant 0 : index
    %210 = vector.load %arg39[%c0_107, %c0_108] : memref<3x10xf32, #tpu.memory_space<vmem>>, vector<3x10xf32>
    %211 = arith.addf %209, %210 : vector<3x10xf32>
    %c0_109 = arith.constant 0 : index
    %c0_110 = arith.constant 0 : index
    %212 = vector.load %arg40[%c0_109, %c0_110] : memref<6x3xf32, #tpu.memory_space<vmem>>, vector<6x3xf32>
    %cst_111 = arith.constant dense<0.000000e+00> : vector<6x10xf32>
    %213 = tpu.matmul %212, %211, %cst_111 {dimension_numbers = #tpu.dot_dimension_numbers<[1], [0], [0], [1], [0, 0, 1, 1], [], []>} : vector<6x3xf32>, vector<3x10xf32>, vector<6x10xf32> -> vector<6x10xf32>
    %214 = arith.addf %149, %213 : vector<6x10xf32>
    %215 = arith.addf %214, %202 : vector<6x10xf32>
    %c0_112 = arith.constant 0 : index
    %c0_113 = arith.constant 0 : index
    %216 = vector.load %arg41[%c0_112, %c0_113] : memref<6x10xf32, #tpu.memory_space<vmem>>, vector<6x10xf32>
    tpu.vector_store %arg41[%c0_112, %c0_113], %215 {strides = array<i32>} : memref<6x10xf32, #tpu.memory_space<vmem>>, vector<6x10xf32>,
    %c0_114 = arith.constant 0 : index
    %c0_115 = arith.constant 0 : index
    %217 = vector.load %arg42[%c0_114, %c0_115] : memref<6x32xf32, #tpu.memory_space<vmem>>, vector<6x32xf32>
    tpu.vector_store %arg42[%c0_114, %c0_115], %130 {strides = array<i32>} : memref<6x32xf32, #tpu.memory_space<vmem>>, vector<6x32xf32>,
    %c0_116 = arith.constant 0 : index
    %c0_117 = arith.constant 0 : index
    %218 = vector.load %arg43[%c0_116, %c0_117] : memref<6x10xf32, #tpu.memory_space<vmem>>, vector<6x10xf32>
    tpu.vector_store %arg43[%c0_116, %c0_117], %213 {strides = array<i32>} : memref<6x10xf32, #tpu.memory_space<vmem>>, vector<6x10xf32>,
    %c0_118 = arith.constant 0 : index
    %c0_119 = arith.constant 0 : index
    %219 = vector.load %arg44[%c0_118, %c0_119] : memref<6x10xf32, #tpu.memory_space<vmem>>, vector<6x10xf32>
    tpu.vector_store %arg44[%c0_118, %c0_119], %202 {strides = array<i32>} : memref<6x10xf32, #tpu.memory_space<vmem>>, vector<6x10xf32>,
    return
  }
  func.func @transform_0(%arg0: i32) -> (i32, i32) {
    %c0_i32 = arith.constant 0 : i32
    %c0_i32_0 = arith.constant 0 : i32
    %c0_i32_1 = arith.constant 0 : i32
    return %c0_i32, %c0_i32_0 : i32, i32
  }
  func.func @transform_1(%arg0: i32) -> (i32, i32) {
    %c0_i32 = arith.constant 0 : i32
    %c0_i32_0 = arith.constant 0 : i32
    %c0_i32_1 = arith.constant 0 : i32
    return %c0_i32, %c0_i32_0 : i32, i32
  }
  func.func @transform_2(%arg0: i32) -> (i32, i32) {
    %c0_i32 = arith.constant 0 : i32
    %c0_i32_0 = arith.constant 0 : i32
    %c0_i32_1 = arith.constant 0 : i32
    return %c0_i32, %c0_i32_0 : i32, i32
  }
  func.func @transform_3(%arg0: i32) -> (i32, i32) {
    %c0_i32 = arith.constant 0 : i32
    %c0_i32_0 = arith.constant 0 : i32
    %c0_i32_1 = arith.constant 0 : i32
    return %c0_i32, %c0_i32_0 : i32, i32
  }
  func.func @transform_4(%arg0: i32) -> (i32, i32) {
    %c0_i32 = arith.constant 0 : i32
    %c0_i32_0 = arith.constant 0 : i32
    %c0_i32_1 = arith.constant 0 : i32
    return %c0_i32, %c0_i32_0 : i32, i32
  }
  func.func @transform_5(%arg0: i32) -> (i32, i32) {
    %c0_i32 = arith.constant 0 : i32
    %c0_i32_0 = arith.constant 0 : i32
    %c0_i32_1 = arith.constant 0 : i32
    return %c0_i32, %c0_i32_0 : i32, i32
  }
  func.func @transform_6(%arg0: i32) -> (i32, i32) {
    %c0_i32 = arith.constant 0 : i32
    %c0_i32_0 = arith.constant 0 : i32
    %c0_i32_1 = arith.constant 0 : i32
    return %c0_i32, %c0_i32_0 : i32, i32
  }
  func.func @transform_7(%arg0: i32) -> (i32, i32) {
    %c0_i32 = arith.constant 0 : i32
    %c0_i32_0 = arith.constant 0 : i32
    %c0_i32_1 = arith.constant 0 : i32
    return %c0_i32, %c0_i32_0 : i32, i32
  }
  func.func @transform_8(%arg0: i32) -> (i32, i32) {
    %c0_i32 = arith.constant 0 : i32
    %c0_i32_0 = arith.constant 0 : i32
    %c0_i32_1 = arith.constant 0 : i32
    return %c0_i32, %c0_i32_0 : i32, i32
  }
  func.func @transform_9(%arg0: i32) -> (i32, i32) {
    %c0_i32 = arith.constant 0 : i32
    %c0_i32_0 = arith.constant 0 : i32
    %c0_i32_1 = arith.constant 0 : i32
    return %c0_i32, %c0_i32_0 : i32, i32
  }
  func.func @transform_10(%arg0: i32) -> (i32, i32) {
    %c0_i32 = arith.constant 0 : i32
    %c0_i32_0 = arith.constant 0 : i32
    %c0_i32_1 = arith.constant 0 : i32
    return %c0_i32, %c0_i32_0 : i32, i32
  }
  func.func @transform_11(%arg0: i32) -> (i32, i32) {
    %c0_i32 = arith.constant 0 : i32
    %c0_i32_0 = arith.constant 0 : i32
    %c0_i32_1 = arith.constant 0 : i32
    return %c0_i32, %c0_i32_0 : i32, i32
  }
  func.func @transform_12(%arg0: i32) -> (i32, i32) {
    %c0_i32 = arith.constant 0 : i32
    %c0_i32_0 = arith.constant 0 : i32
    %c0_i32_1 = arith.constant 0 : i32
    return %c0_i32, %c0_i32_0 : i32, i32
  }
  func.func @transform_13(%arg0: i32) -> (i32, i32) {
    %c0_i32 = arith.constant 0 : i32
    %c0_i32_0 = arith.constant 0 : i32
    %c0_i32_1 = arith.constant 0 : i32
    return %c0_i32, %c0_i32_0 : i32, i32
  }
  func.func @transform_14(%arg0: i32) -> (i32, i32) {
    %c0_i32 = arith.constant 0 : i32
    %c0_i32_0 = arith.constant 0 : i32
    %c0_i32_1 = arith.constant 0 : i32
    return %c0_i32, %c0_i32_0 : i32, i32
  }
  func.func @transform_15(%arg0: i32) -> (i32, i32) {
    %c0_i32 = arith.constant 0 : i32
    %c0_i32_0 = arith.constant 0 : i32
    %c0_i32_1 = arith.constant 0 : i32
    return %c0_i32, %c0_i32_0 : i32, i32
  }
  func.func @transform_16(%arg0: i32) -> (i32, i32) {
    %c0_i32 = arith.constant 0 : i32
    %c0_i32_0 = arith.constant 0 : i32
    %c0_i32_1 = arith.constant 0 : i32
    return %c0_i32, %c0_i32_0 : i32, i32
  }
  func.func @transform_17(%arg0: i32) -> (i32, i32) {
    %c0_i32 = arith.constant 0 : i32
    %c0_i32_0 = arith.constant 0 : i32
    %c0_i32_1 = arith.constant 0 : i32
    return %c0_i32, %c0_i32_0 : i32, i32
  }
  func.func @transform_18(%arg0: i32) -> (i32, i32) {
    %c0_i32 = arith.constant 0 : i32
    %c0_i32_0 = arith.constant 0 : i32
    %c0_i32_1 = arith.constant 0 : i32
    return %c0_i32, %c0_i32_0 : i32, i32
  }
  func.func @transform_19(%arg0: i32) -> (i32, i32) {
    %c0_i32 = arith.constant 0 : i32
    %c0_i32_0 = arith.constant 0 : i32
    %c0_i32_1 = arith.constant 0 : i32
    return %c0_i32, %c0_i32_0 : i32, i32
  }
  func.func @transform_20(%arg0: i32) -> (i32, i32) {
    %c0_i32 = arith.constant 0 : i32
    %c0_i32_0 = arith.constant 0 : i32
    %c0_i32_1 = arith.constant 0 : i32
    return %c0_i32, %c0_i32_0 : i32, i32
  }
  func.func @transform_21(%arg0: i32) -> (i32, i32) {
    %c0_i32 = arith.constant 0 : i32
    %c0_i32_0 = arith.constant 0 : i32
    %c0_i32_1 = arith.constant 0 : i32
    return %c0_i32, %c0_i32_0 : i32, i32
  }
  func.func @transform_22(%arg0: i32) -> (i32, i32) {
    %c0_i32 = arith.constant 0 : i32
    %c0_i32_0 = arith.constant 0 : i32
    %c0_i32_1 = arith.constant 0 : i32
    return %c0_i32, %c0_i32_0 : i32, i32
  }
  func.func @transform_23(%arg0: i32) -> (i32, i32) {
    %c0_i32 = arith.constant 0 : i32
    %c0_i32_0 = arith.constant 0 : i32
    %c0_i32_1 = arith.constant 0 : i32
    return %c0_i32, %c0_i32_0 : i32, i32
  }
  func.func @transform_24(%arg0: i32) -> (i32, i32) {
    %c0_i32 = arith.constant 0 : i32
    %c0_i32_0 = arith.constant 0 : i32
    %c0_i32_1 = arith.constant 0 : i32
    return %c0_i32, %c0_i32_0 : i32, i32
  }
  func.func @transform_25(%arg0: i32) -> (i32, i32) {
    %c0_i32 = arith.constant 0 : i32
    %c0_i32_0 = arith.constant 0 : i32
    %c0_i32_1 = arith.constant 0 : i32
    return %c0_i32, %c0_i32_0 : i32, i32
  }
  func.func @transform_26(%arg0: i32) -> (i32, i32) {
    %c0_i32 = arith.constant 0 : i32
    %c0_i32_0 = arith.constant 0 : i32
    %c0_i32_1 = arith.constant 0 : i32
    return %c0_i32, %c0_i32_0 : i32, i32
  }
  func.func @transform_27(%arg0: i32) -> (i32, i32) {
    %c0_i32 = arith.constant 0 : i32
    %c0_i32_0 = arith.constant 0 : i32
    %c0_i32_1 = arith.constant 0 : i32
    return %c0_i32, %c0_i32_0 : i32, i32
  }
  func.func @transform_28(%arg0: i32) -> (i32, i32) {
    %c0_i32 = arith.constant 0 : i32
    %c0_i32_0 = arith.constant 0 : i32
    %c0_i32_1 = arith.constant 0 : i32
    return %c0_i32, %c0_i32_0 : i32, i32
  }
  func.func @transform_29(%arg0: i32) -> (i32, i32) {
    %c0_i32 = arith.constant 0 : i32
    %c0_i32_0 = arith.constant 0 : i32
    %c0_i32_1 = arith.constant 0 : i32
    return %c0_i32, %c0_i32_0 : i32, i32
  }
  func.func @transform_30(%arg0: i32) -> (i32, i32) {
    %c0_i32 = arith.constant 0 : i32
    %c0_i32_0 = arith.constant 0 : i32
    %c0_i32_1 = arith.constant 0 : i32
    return %c0_i32, %c0_i32_0 : i32, i32
  }
  func.func @transform_31(%arg0: i32) -> (i32, i32) {
    %c0_i32 = arith.constant 0 : i32
    %c0_i32_0 = arith.constant 0 : i32
    %c0_i32_1 = arith.constant 0 : i32
    return %c0_i32, %c0_i32_0 : i32, i32
  }
  func.func @transform_32(%arg0: i32) -> (i32, i32) {
    %c0_i32 = arith.constant 0 : i32
    %c0_i32_0 = arith.constant 0 : i32
    %c0_i32_1 = arith.constant 0 : i32
    return %c0_i32, %c0_i32_0 : i32, i32
  }
  func.func @transform_33(%arg0: i32) -> (i32, i32) {
    %c0_i32 = arith.constant 0 : i32
    %c0_i32_0 = arith.constant 0 : i32
    %c0_i32_1 = arith.constant 0 : i32
    return %c0_i32, %c0_i32_0 : i32, i32
  }
  func.func @transform_34(%arg0: i32) -> (i32, i32) {
    %c0_i32 = arith.constant 0 : i32
    %c0_i32_0 = arith.constant 0 : i32
    %c0_i32_1 = arith.constant 0 : i32
    return %c0_i32, %c0_i32_0 : i32, i32
  }
  func.func @transform_35(%arg0: i32) -> (i32, i32) {
    %c0_i32 = arith.constant 0 : i32
    %c0_i32_0 = arith.constant 0 : i32
    %c0_i32_1 = arith.constant 0 : i32
    return %c0_i32, %c0_i32_0 : i32, i32
  }
  func.func @transform_36(%arg0: i32) -> (i32, i32) {
    %c0_i32 = arith.constant 0 : i32
    %c0_i32_0 = arith.constant 0 : i32
    %c0_i32_1 = arith.constant 0 : i32
    return %c0_i32, %c0_i32_0 : i32, i32
  }
  func.func @transform_37(%arg0: i32) -> (i32, i32) {
    %c0_i32 = arith.constant 0 : i32
    %c0_i32_0 = arith.constant 0 : i32
    %c0_i32_1 = arith.constant 0 : i32
    return %c0_i32, %c0_i32_0 : i32, i32
  }
  func.func @transform_38(%arg0: i32) -> (i32, i32) {
    %c0_i32 = arith.constant 0 : i32
    %c0_i32_0 = arith.constant 0 : i32
    %c0_i32_1 = arith.constant 0 : i32
    return %c0_i32, %c0_i32_0 : i32, i32
  }
  func.func @transform_39(%arg0: i32) -> (i32, i32) {
    %c0_i32 = arith.constant 0 : i32
    %c0_i32_0 = arith.constant 0 : i32
    %c0_i32_1 = arith.constant 0 : i32
    return %c0_i32, %c0_i32_0 : i32, i32
  }
  func.func @transform_40(%arg0: i32) -> (i32, i32) {
    %c0_i32 = arith.constant 0 : i32
    %c0_i32_0 = arith.constant 0 : i32
    %c0_i32_1 = arith.constant 0 : i32
    return %c0_i32, %c0_i32_0 : i32, i32
  }
  func.func @transform_41(%arg0: i32) -> (i32, i32) {
    %c0_i32 = arith.constant 0 : i32
    %c0_i32_0 = arith.constant 0 : i32
    %c0_i32_1 = arith.constant 0 : i32
    return %c0_i32, %c0_i32_0 : i32, i32
  }
  func.func @transform_42(%arg0: i32) -> (i32, i32) {
    %c0_i32 = arith.constant 0 : i32
    %c0_i32_0 = arith.constant 0 : i32
    %c0_i32_1 = arith.constant 0 : i32
    return %c0_i32, %c0_i32_0 : i32, i32
  }
  func.func @transform_43(%arg0: i32) -> (i32, i32) {
    %c0_i32 = arith.constant 0 : i32
    %c0_i32_0 = arith.constant 0 : i32
    %c0_i32_1 = arith.constant 0 : i32
    return %c0_i32, %c0_i32_0 : i32, i32
  }
}

</mosaic_0001>

<bundles_post_ra>
// kernel: fox_hpns_forward.1
= control target key start
LH: loop header
LB: loop body
LE: loop exit
PB: predicated region body
PF: predicated region fallthrough
CT: control target
= control target key end

     0   :  { %s3253_s6 = smov 1   ;;  %s3254_s10 = smov 2   ;;  %s3936_s0 = inlined_call_operand.smem [shape: u32[44], index: -1, kind: input, shape index: {}] }
   0x1   :  { %s3331_s5 = sld [smem:[%s3936_s0]]   ;;  %s3255_s14 = smov 3  }
   0x2   :  { %s3336_s9 = sld [smem:[%s3936_s0 + %s3253_s6]]   ;;  %s3256_s18 = smov 4  }
   0x3   :  { %s3341_s13 = sld [smem:[%s3936_s0 + %s3254_s10]]   ;;  %s3257_s22 = smov 5  }
   0x4   :  { %s3346_s17 = sld [smem:[%s3936_s0 + %s3255_s14]]   ;;  %s3258_s26 = smov 6  }
   0x5   :  { %s3351_s21 = sld [smem:[%s3936_s0 + %s3256_s18]]   ;;  %s3259_s30 = smov 7  }
   0x6   :  { %s3356_s25 = sld [smem:[%s3936_s0 + %s3257_s22]]   ;;  %s3260_s4 = smov 8  }
   0x7   :  { %s3361_s29 = sld [smem:[%s3936_s0 + %s3258_s26]]   ;;  %s3261_s10 = smov 9  }
   0x8   :  { %3953 = sst [smem:[#allocation32_spill]] %s3336_s9  ;;  %s3262_s15 = smov 10  }
   0x9   :  { %3954 = sst [smem:[#allocation33_spill]] %s3341_s13  ;;  %s3263_s20 = smov 11  }
   0xa   :  { %3955 = sst [smem:[#allocation34_spill]] %s3346_s17  ;;  %s3264_s26 = smov 12  }
   0xb   :  { %s3366_s3 = sld [smem:[%s3936_s0 + %s3259_s30]]   ;;  %s3265_s1 = smov 13  }
   0xc   :  { %s3371_s8 = sld [smem:[%s3936_s0 + %s3260_s4]]   ;;  %s3266_s7 = smov 14  }
   0xd   :  { %3956 = sst [smem:[#allocation35_spill]] %s3361_s29  ;;  %s3268_s22 = smov 16  }
   0xe   :  { %s3376_s14 = sld [smem:[%s3936_s0 + %s3261_s10]]   ;;  %s3269_s28 = smov 17  }
   0xf   :  { %s3381_s19 = sld [smem:[%s3936_s0 + %s3262_s15]]   ;;  %s3267_s15 = smov 15  }
  0x10   :  { %s3386_s24 = sld [smem:[%s3936_s0 + %s3263_s20]]  }
  0x11   :  { %s3391_s30 = sld [smem:[%s3936_s0 + %s3264_s26]]  }
  0x12   :  { %s3396_s6 = sld [smem:[%s3936_s0 + %s3265_s1]]  }
  0x13   :  { %s3401_s12 = sld [smem:[%s3936_s0 + %s3266_s7]]   ;;  %s3270_s7 = smov 18  }
  0x14   :  { %3957 = sst [smem:[#allocation36_spill]] %s3376_s14 }
  0x15   :  { %3958 = sst [smem:[#allocation37_spill]] %s3381_s19 }
  0x16   :  { %3959 = sst [smem:[#allocation38_spill]] %s3386_s24 }
  0x17   :  { %s3406_s20 = sld [smem:[%s3936_s0 + %s3267_s15]]   ;;  %s3271_s15 = smov 19  }
  0x18   :  { %3960 = sst [smem:[#allocation39_spill]] %s3396_s6 }
  0x19   :  { %3961 = sst [smem:[#allocation40_spill]] %s3401_s12 }
  0x1a   :  { %s3411_s27 = sld [smem:[%s3936_s0 + %s3268_s22]]   ;;  %s3272_s22 = smov 20  }
  0x1b   :  { %s3416_s4 = sld [smem:[%s3936_s0 + %s3269_s28]]   ;;  %s3273_s28 = smov 21  }
  0x1c   :  { %s3421_s9 = sld [smem:[%s3936_s0 + %s3270_s7]]   ;;  %s3274_s7 = smov 22  }
  0x1d   :  { %3962 = sst [smem:[#allocation41_spill]] %s3406_s20 }
  0x1e   :  { %s3426_s29 = sld [smem:[%s3936_s0 + %s3271_s15]]   ;;  %s3275_s15 = smov 23  }
  0x20   :  { %3963 = sst [smem:[#allocation42_spill]] %s3411_s27 }
  0x21   :  { %3964 = sst [smem:[#allocation43_spill]] %s3416_s4 }
  0x22   :  { %3965 = sst [smem:[#allocation44_spill]] %s3421_s9 }
  0x23   :  { %s3431_s27 = sld [smem:[%s3936_s0 + %s3272_s22]]   ;;  %s3276_s22 = smov 24  }
  0x24   :  { %3966 = sst [smem:[#allocation45_spill]] %s3426_s29 }
  0x25   :  { %s3436_s4 = sld [smem:[%s3936_s0 + %s3273_s28]]   ;;  %s3277_s28 = smov 25  }
  0x26   :  { %s3441_s9 = sld [smem:[%s3936_s0 + %s3274_s7]]   ;;  %s3278_s7 = smov 26  }
  0x27   :  { %s3446_s29 = sld [smem:[%s3936_s0 + %s3275_s15]]   ;;  %s3279_s15 = smov 27  }
  0x28   :  { %s3456_s12 = sld [smem:[%s3936_s0 + %s3277_s28]]   ;;  %s3281_s28 = smov 29  }
  0x29   :  { %3967 = sst [smem:[#allocation46_spill]] %s3431_s27 }
  0x2a   :  { %s3451_s27 = sld [smem:[%s3936_s0 + %s3276_s22]]   ;;  %s3280_s22 = smov 28  }
  0x2b   :  { %s3461_s20 = sld [smem:[%s3936_s0 + %s3278_s7]]   ;;  %s3282_s7 = smov 30  }
  0x2c   :  { %s3471_s6 = sld [smem:[%s3936_s0 + %s3280_s22]]   ;;  %s3284_s22 = smov 32  }
  0x2d   :  { %3968 = sst [smem:[#allocation47_spill]] %s3446_s29 }
  0x2e   :  { %3969 = sst [smem:[#allocation48_spill]] %s3456_s12 }
  0x2f   :  { %s3466_s29 = sld [smem:[%s3936_s0 + %s3279_s15]]   ;;  %s3283_s15 = smov 31  }
  0x30   :  { %s3476_s12 = sld [smem:[%s3936_s0 + %s3281_s28]]   ;;  %s3285_s28 = smov 33  }
  0x31   :  { %3970 = sst [smem:[#allocation49_spill]] %s3461_s20 }
  0x32   :  { %s3481_s20 = sld [smem:[%s3936_s0 + %s3282_s7]]   ;;  %s3286_s7 = smov 34  }
  0x33   :  { %s3486_s19 = sld [smem:[%s3936_s0 + %s3283_s15]]   ;;  %s3287_s15 = smov 35  }
  0x34   :  { %s3491_s17 = sld [smem:[%s3936_s0 + %s3284_s22]]   ;;  %s3288_s22 = smov 36  }
  0x35   :  { %s3501_s24 = sld [smem:[%s3936_s0 + %s3286_s7]]   ;;  %s3290_s7 = smov 38  }
  0x36   :  { %3971 = sst [smem:[#allocation50_spill]] %s3476_s12 }
  0x37   :  { %s3496_s12 = sld [smem:[%s3936_s0 + %s3285_s28]]   ;;  %s3289_s28 = smov 37  }
  0x38   :  { %s3511_s14 = sld [smem:[%s3936_s0 + %s3288_s22]]   ;;  %s3292_s22 = smov 40  }
  0x39   :  { %3972 = sst [smem:[#allocation51_spill]] %s3486_s19 }
  0x3a   :  { %s3506_s19 = sld [smem:[%s3936_s0 + %s3287_s15]]   ;;  %s3291_s15 = smov 39  }
  0x3b   :  { %s3521_s13 = sld [smem:[%s3936_s0 + %s3290_s7]]   ;;  %s3294_s7 = smov 42  }
  0x3d   :  { %3973 = sst [smem:[#allocation52_spill]] %s3496_s12 }
  0x3e   :  { %3975 = sst [smem:[#allocation54_spill]] %s3511_s14 }
  0x3f   :  { %s3516_s12 = sld [smem:[%s3936_s0 + %s3289_s28]]   ;;  %s3293_s28 = smov 41  }
  0x40   :  { %3974 = sst [smem:[#allocation53_spill]] %s3506_s19 }
  0x41   :  { %3977 = sst [smem:[#allocation56_spill]] %s3521_s13 }
  0x42   :  { %s3526_s19 = sld [smem:[%s3936_s0 + %s3291_s15]]   ;;  %s3295_s15 = smov 43  }
  0x43   :  { %s3531_s14 = sld [smem:[%s3936_s0 + %s3292_s22]]  }
  0x44   :  { %s3541_s13 = sld [smem:[%s3936_s0 + %s3294_s7]]  }
  0x45   :  { %3976 = sst [smem:[#allocation55_spill]] %s3516_s12 }
  0x46   :  { %s3536_s12 = sld [smem:[%s3936_s0 + %s3293_s28]]  }
  0x48   :  { %3978 = sst [smem:[#allocation57_spill]] %s3526_s19 }
  0x49   :  { %s3546_s19 = sld [smem:[%s3936_s0 + %s3295_s15]]  }
  0x4a   :  { %93 = vsyncpa [#allocation3], 0 }
  0x4b   :  { %94 = vsyncpa [#allocation5], 0 }
  0x4c   :  { %95 = vsyncpa [#allocation8], 0 }
  0x4d   :  { %96 = vsyncpa [#allocation11], 0 }
  0x4e   :  { %97 = vsyncpa [#allocation14], 0 }
  0x4f   :  { %98 = vsyncpa [#allocation17], 0 }
  0x50   :  { %99 = vsyncpa [#allocation20], 0 }
  0x51   :  { %100 = vsyncpa [#allocation23], 0  ;;  %s3296_s22 = smov [#allocation4]   ;;  %s3297_s26 = smov [#allocation7]  }
  0x52   :  { %s123_s23 = sshll.u32 %s3296_s22, 4  ;;  %s145_s28 = sshll.u32 %s3297_s26, 4  ;;  %s124_s23 = int_to_ptr.vmem [resolvable:$true] %s123_s23  ;;  %s146_s28 = int_to_ptr.vmem [resolvable:$true] %s145_s28 }
  0x53   :  { %s2929_s1 = scalar_lea.hbm %s3351_s21, 128 }
  0x54   :  { %p2930_p0 = scmp.ne.s32.totalorder %s3351_s21, %s2929_s1  ;;  %p2933_p1 = scmp.lt.u32.totalorder %s2929_s1, %s3351_s21 }
  0x56   :  { %p2935_p2 = pnand %p2933_p1, %p2930_p0 }
  0x58   :  { %2938 = shalt.err (!%p2935_p2)
}
  0x59   :  { %s2939_s0 = scalar_lea.vmem %s124_s23, 128  ;;  %p2944_p4 = scmp.lt.s32.totalorder %s124_s23, %s124_s23 }
  0x5a   :  { %p2940_p3 = scmp.ne.s32.totalorder %s124_s23, %s2939_s0  ;;  %p2945_p5 = scmp.lt.s32.totalorder %s2939_s0, %s2939_s0 }
  0x5c   :  { %p2946_p6 = por %p2945_p5, %p2944_p4 }
  0x5e   :  { %p2947_p7 = pnand %p2946_p6, %p2940_p3 }
  0x60   :  { %2950 = shalt.err (!%p2947_p7)
}
  0x61   :  { %126 = dma.hbm_to_vmem [thread:$0]  %s3351_s21, 128, %s124_s23, [#allocation5]  }
  0x62   :  { %s2951_s2 = scalar_lea.hbm %s3366_s3, 128 }
  0x63   :  { %p2952_p8 = scmp.ne.s32.totalorder %s3366_s3, %s2951_s2  ;;  %p2955_p9 = scmp.lt.u32.totalorder %s2951_s2, %s3366_s3 }
  0x65   :  { %p2957_p10 = pnand %p2955_p9, %p2952_p8 }
  0x67   :  { %2960 = shalt.err (!%p2957_p10)
}
  0x68   :  { %s2961_s7 = scalar_lea.vmem %s146_s28, 128  ;;  %p2966_p12 = scmp.lt.s32.totalorder %s146_s28, %s146_s28 }
  0x69   :  { %p2962_p11 = scmp.ne.s32.totalorder %s146_s28, %s2961_s7  ;;  %p2967_p13 = scmp.lt.s32.totalorder %s2961_s7, %s2961_s7 }
  0x6b   :  { %p2968_p0 = por %p2967_p13, %p2966_p12 }
  0x6d   :  { %p2969_p1 = pnand %p2968_p0, %p2962_p11 }
  0x6f   :  { %2972 = shalt.err (!%p2969_p1)
}
  0x70   :  { %148 = dma.hbm_to_vmem [thread:$0]  %s3366_s3, 128, %s146_s28, [#allocation8]  }
  0x71   :  { %s3298_s10 = smov [#allocation10]   ;;  %s3299_s21 = smov [#allocation13]  }
  0x72   :  { %s171_s11 = sshll.u32 %s3298_s10, 4  ;;  %s207_s15 = sshll.u32 %s3299_s21, 4  ;;  %s172_s11 = int_to_ptr.vmem [resolvable:$true] %s171_s11  ;;  %s208_s15 = int_to_ptr.vmem [resolvable:$true] %s207_s15 }
  0x73   :  { %s2973_s16 = scalar_lea.hbm %s3391_s30, 16 }
  0x74   :  { %p2974_p2 = scmp.ne.s32.totalorder %s3391_s30, %s2973_s16  ;;  %p2977_p3 = scmp.lt.u32.totalorder %s2973_s16, %s3391_s30 }
  0x76   :  { %p2979_p4 = pnand %p2977_p3, %p2974_p2 }
  0x78   :  { %2982 = shalt.err (!%p2979_p4)
}
  0x79   :  { %s2983_s18 = scalar_lea.vmem %s172_s11, 16  ;;  %s2987_s22 = scalar_lea.vmem %s172_s11, 32 }
  0x7a   :  { %p2984_p5 = scmp.ne.s32.totalorder %s172_s11, %s2983_s18  ;;  %p2988_p6 = scmp.lt.s32.totalorder %s172_s11, %s172_s11 }
  0x7b   :  { %p2989_p7 = scmp.lt.s32.totalorder %s2987_s22, %s2983_s18 }
  0x7d   :  { %p2990_p8 = por %p2989_p7, %p2988_p6 }
  0x7f   :  { %p2991_p9 = pnand %p2990_p8, %p2984_p5 }
  0x81   :  { %2994 = shalt.err (!%p2991_p9)
}
  0x82   :  { %174 = dma.hbm_to_vmem [thread:$0]  %s3391_s30, 16, %s172_s11, [#allocation11]  }
  0x83   :  { %s2995_s3 = scalar_lea.hbm %s3441_s9, 16 }
  0x84   :  { %p2996_p10 = scmp.ne.s32.totalorder %s3441_s9, %s2995_s3  ;;  %p2999_p11 = scmp.lt.u32.totalorder %s2995_s3, %s3441_s9 }
  0x86   :  { %p3001_p12 = pnand %p2999_p11, %p2996_p10 }
  0x88   :  { %3004 = shalt.err (!%p3001_p12)
}
  0x89   :  { %s3005_s23 = scalar_lea.vmem %s208_s15, 16  ;;  %s3009_s26 = scalar_lea.vmem %s208_s15, 32 }
  0x8a   :  { %p3006_p13 = scmp.ne.s32.totalorder %s208_s15, %s3005_s23  ;;  %p3010_p0 = scmp.lt.s32.totalorder %s208_s15, %s208_s15 }
  0x8b   :  { %p3011_p1 = scmp.lt.s32.totalorder %s3009_s26, %s3005_s23 }
  0x8d   :  { %p3012_p2 = por %p3011_p1, %p3010_p0 }
  0x8f   :  { %p3013_p3 = pnand %p3012_p2, %p3006_p13 }
  0x91   :  { %3016 = shalt.err (!%p3013_p3)
}
  0x92   :  { %210 = dma.hbm_to_vmem [thread:$0]  %s3441_s9, 16, %s208_s15, [#allocation14]  }
  0x93   :  { %s3300_s28 = smov [#allocation16]   ;;  %s3301_s1 = smov [#allocation19]  }
  0x94   :  { %s233_s30 = sshll.u32 %s3300_s28, 4  ;;  %s255_s0 = sshll.u32 %s3301_s1, 4  ;;  %s234_s30 = int_to_ptr.vmem [resolvable:$true] %s233_s30  ;;  %s256_s0 = int_to_ptr.vmem [resolvable:$true] %s255_s0 }
  0x95   :  { %s3017_s2 = scalar_lea.hbm %s3466_s29, 16 }
  0x96   :  { %p3018_p4 = scmp.ne.s32.totalorder %s3466_s29, %s3017_s2  ;;  %p3021_p5 = scmp.lt.u32.totalorder %s3017_s2, %s3466_s29 }
  0x98   :  { %p3023_p6 = pnand %p3021_p5, %p3018_p4 }
  0x9a   :  { %3026 = shalt.err (!%p3023_p6)
}
  0x9b   :  { %s3027_s7 = scalar_lea.vmem %s234_s30, 16  ;;  %s3031_s10 = scalar_lea.vmem %s234_s30, 32 }
  0x9c   :  { %p3028_p7 = scmp.ne.s32.totalorder %s234_s30, %s3027_s7  ;;  %p3032_p8 = scmp.lt.s32.totalorder %s234_s30, %s234_s30 }
  0x9d   :  { %p3033_p9 = scmp.lt.s32.totalorder %s3031_s10, %s3027_s7 }
  0x9f   :  { %p3034_p10 = por %p3033_p9, %p3032_p8 }
  0xa1   :  { %p3035_p11 = pnand %p3034_p10, %p3028_p7 }
  0xa3   :  { %3038 = shalt.err (!%p3035_p11)
}
  0xa4   :  { %236 = dma.hbm_to_vmem [thread:$0]  %s3466_s29, 16, %s234_s30, [#allocation17]  }
  0xa5   :  { %s3039_s9 = scalar_lea.hbm %s3481_s20, 16 }
  0xa6   :  { %p3040_p12 = scmp.ne.s32.totalorder %s3481_s20, %s3039_s9  ;;  %p3043_p13 = scmp.lt.u32.totalorder %s3039_s9, %s3481_s20 }
  0xa8   :  { %p3045_p0 = pnand %p3043_p13, %p3040_p12 }
  0xaa   :  { %3048 = shalt.err (!%p3045_p0)
}
  0xab   :  { %s3049_s11 = scalar_lea.vmem %s256_s0, 16  ;;  %s3053_s21 = scalar_lea.vmem %s256_s0, 32 }
  0xac   :  { %p3050_p1 = scmp.ne.s32.totalorder %s256_s0, %s3049_s11  ;;  %p3054_p2 = scmp.lt.s32.totalorder %s256_s0, %s256_s0 }
  0xad   :  { %p3055_p3 = scmp.lt.s32.totalorder %s3053_s21, %s3049_s11 }
  0xaf   :  { %p3056_p4 = por %p3055_p3, %p3054_p2 }
  0xb1   :  { %p3057_p5 = pnand %p3056_p4, %p3050_p1 }
  0xb3   :  { %3060 = shalt.err (!%p3057_p5)
}
  0xb4   :  { %258 = dma.hbm_to_vmem [thread:$0]  %s3481_s20, 16, %s256_s0, [#allocation20]  }
  0xb5   :  { %s3302_s15 = smov [#allocation2]   ;;  %s3303_s16 = smov [#allocation6]  }
  0xb6   :  { %s107_s29 = sshll.u32 %s3302_s15, 4  ;;  %s133_s18 = sshll.u32 %s3303_s16, 4  ;;  %s108_s29 = int_to_ptr.vmem [resolvable:$true] %s107_s29  ;;  %s134_s18 = int_to_ptr.vmem [resolvable:$true] %s133_s18 }
  0xb7   :  { %s3061_s22 = scalar_lea.hbm %s3331_s5, 128 }
  0xb8   :  { %p3062_p6 = scmp.ne.s32.totalorder %s3331_s5, %s3061_s22  ;;  %p3065_p7 = scmp.lt.u32.totalorder %s3061_s22, %s3331_s5 }
  0xba   :  { %p3067_p8 = pnand %p3065_p7, %p3062_p6 }
  0xbc   :  { %3070 = shalt.err (!%p3067_p8)
}
  0xbd   :  { %s3071_s3 = scalar_lea.vmem %s108_s29, 128  ;;  %p3076_p10 = scmp.lt.s32.totalorder %s108_s29, %s108_s29 }
  0xbe   :  { %p3072_p9 = scmp.ne.s32.totalorder %s108_s29, %s3071_s3  ;;  %p3077_p11 = scmp.lt.s32.totalorder %s3071_s3, %s3071_s3 }
  0xc0   :  { %p3078_p12 = por %p3077_p11, %p3076_p10 }
  0xc2   :  { %p3079_p13 = pnand %p3078_p12, %p3072_p9 }
  0xc4   :  { %3082 = shalt.err (!%p3079_p13)
}
  0xc5   :  { %110 = dma.hbm_to_vmem [thread:$0]  %s3331_s5, 128, %s108_s29, [#allocation3]  }
  0xc6   :  { %s3083_s20 = scalar_lea.hbm %s3356_s25, 128 }
  0xc7   :  { %p3084_p0 = scmp.ne.s32.totalorder %s3356_s25, %s3083_s20  ;;  %p3087_p1 = scmp.lt.u32.totalorder %s3083_s20, %s3356_s25 }
  0xc9   :  { %p3089_p2 = pnand %p3087_p1, %p3084_p0 }
  0xcb   :  { %3092 = shalt.err (!%p3089_p2)
}
  0xcc   :  { %s3093_s23 = scalar_lea.vmem %s134_s18, 128  ;;  %p3098_p4 = scmp.lt.s32.totalorder %s134_s18, %s134_s18 }
  0xcd   :  { %p3094_p3 = scmp.ne.s32.totalorder %s134_s18, %s3093_s23  ;;  %p3099_p5 = scmp.lt.s32.totalorder %s3093_s23, %s3093_s23 }
  0xcf   :  { %p3100_p6 = por %p3099_p5, %p3098_p4 }
  0xd1   :  { %p3101_p7 = pnand %p3100_p6, %p3094_p3 }
  0xd3   :  { %3104 = shalt.err (!%p3101_p7)
}
  0xd4   :  { %136 = dma.hbm_to_vmem [thread:$0]  %s3356_s25, 128, %s134_s18, [#allocation5]  }
  0xd5   :  { %s3304_s26 = smov [#allocation9]   ;;  %s3305_s5 = smov [#allocation12]  }
  0xd6   :  { %s155_s28 = sshll.u32 %s3304_s26, 4  ;;  %s197_s30 = sshll.u32 %s3305_s5, 4  ;;  %s156_s28 = int_to_ptr.vmem [resolvable:$true] %s155_s28  ;;  %s198_s30 = int_to_ptr.vmem [resolvable:$true] %s197_s30 }
  0xd7   :  { %s3105_s1 = scalar_lea.hbm %s3371_s8, 16 }
  0xd8   :  { %p3106_p8 = scmp.ne.s32.totalorder %s3371_s8, %s3105_s1  ;;  %p3109_p9 = scmp.lt.u32.totalorder %s3105_s1, %s3371_s8 }
  0xda   :  { %p3111_p10 = pnand %p3109_p9, %p3106_p8 }
  0xdc   :  { %3114 = shalt.err (!%p3111_p10)
}
  0xdd   :  { %s3115_s0 = scalar_lea.vmem %s156_s28, 16  ;;  %s3119_s2 = scalar_lea.vmem %s156_s28, 32 }
  0xde   :  { %p3116_p11 = scmp.ne.s32.totalorder %s156_s28, %s3115_s0  ;;  %p3120_p12 = scmp.lt.s32.totalorder %s156_s28, %s156_s28 }
  0xdf   :  { %p3121_p13 = scmp.lt.s32.totalorder %s3119_s2, %s3115_s0 }
  0xe1   :  { %p3122_p0 = por %p3121_p13, %p3120_p12 }
  0xe3   :  { %p3123_p1 = pnand %p3122_p0, %p3116_p11 }
  0xe5   :  { %3126 = shalt.err (!%p3123_p1)
}
  0xe6   :  { %158 = dma.hbm_to_vmem [thread:$0]  %s3371_s8, 16, %s156_s28, [#allocation8]  }
  0xe7   :  { %s3127_s25 = scalar_lea.hbm %s3436_s4, 16 }
  0xe8   :  { %p3128_p2 = scmp.ne.s32.totalorder %s3436_s4, %s3127_s25  ;;  %p3131_p3 = scmp.lt.u32.totalorder %s3127_s25, %s3436_s4 }
  0xea   :  { %p3133_p4 = pnand %p3131_p3, %p3128_p2 }
  0xec   :  { %3136 = shalt.err (!%p3133_p4)
}
  0xed   :  { %s3137_s7 = scalar_lea.vmem %s198_s30, 16  ;;  %s3141_s10 = scalar_lea.vmem %s198_s30, 32 }
  0xee   :  { %p3138_p5 = scmp.ne.s32.totalorder %s198_s30, %s3137_s7  ;;  %p3142_p6 = scmp.lt.s32.totalorder %s198_s30, %s198_s30 }
  0xef   :  { %p3143_p7 = scmp.lt.s32.totalorder %s3141_s10, %s3137_s7 }
  0xf1   :  { %p3144_p8 = por %p3143_p7, %p3142_p6 }
  0xf3   :  { %p3145_p9 = pnand %p3144_p8, %p3138_p5 }
  0xf5   :  { %3148 = shalt.err (!%p3145_p9)
}
  0xf6   :  { %200 = dma.hbm_to_vmem [thread:$0]  %s3436_s4, 16, %s198_s30, [#allocation11]  }
  0xf7   :  { %s3306_s9 = smov [#allocation15]   ;;  %s3307_s11 = smov [#allocation18]  }
  0xf8   :  { %s219_s8 = sshll.u32 %s3306_s9, 4  ;;  %s243_s21 = sshll.u32 %s3307_s11, 4  ;;  %s220_s8 = int_to_ptr.vmem [resolvable:$true] %s219_s8  ;;  %s244_s21 = int_to_ptr.vmem [resolvable:$true] %s243_s21 }
  0xf9   :  { %s3149_s15 = scalar_lea.hbm %s3451_s27, 16 }
  0xfa   :  { %p3150_p10 = scmp.ne.s32.totalorder %s3451_s27, %s3149_s15  ;;  %p3153_p11 = scmp.lt.u32.totalorder %s3149_s15, %s3451_s27 }
  0xfc   :  { %p3155_p12 = pnand %p3153_p11, %p3150_p10 }
  0xfe   :  { %3158 = shalt.err (!%p3155_p12)
}
  0xff   :  { %s3159_s29 = scalar_lea.vmem %s220_s8, 16  ;;  %s3163_s16 = scalar_lea.vmem %s220_s8, 32 }
 0x100   :  { %p3160_p13 = scmp.ne.s32.totalorder %s220_s8, %s3159_s29  ;;  %p3164_p0 = scmp.lt.s32.totalorder %s220_s8, %s220_s8 }
 0x101   :  { %p3165_p1 = scmp.lt.s32.totalorder %s3163_s16, %s3159_s29 }
 0x103   :  { %p3166_p2 = por %p3165_p1, %p3164_p0 }
 0x105   :  { %p3167_p3 = pnand %p3166_p2, %p3160_p13 }
 0x107   :  { %3170 = shalt.err (!%p3167_p3)
}
 0x108   :  { %222 = dma.hbm_to_vmem [thread:$0]  %s3451_s27, 16, %s220_s8, [#allocation14]  }
 0x109   :  { %s3171_s4 = scalar_lea.hbm %s3471_s6, 16 }
 0x10a   :  { %p3172_p4 = scmp.ne.s32.totalorder %s3471_s6, %s3171_s4  ;;  %p3175_p5 = scmp.lt.u32.totalorder %s3171_s4, %s3471_s6 }
 0x10c   :  { %p3177_p6 = pnand %p3175_p5, %p3172_p4 }
 0x10e   :  { %3180 = shalt.err (!%p3177_p6)
}
 0x10f   :  { %s3181_s18 = scalar_lea.vmem %s244_s21, 16  ;;  %s3185_s22 = scalar_lea.vmem %s244_s21, 32 }
 0x110   :  { %p3182_p7 = scmp.ne.s32.totalorder %s244_s21, %s3181_s18  ;;  %p3186_p8 = scmp.lt.s32.totalorder %s244_s21, %s244_s21 }
 0x111   :  { %p3187_p9 = scmp.lt.s32.totalorder %s3185_s22, %s3181_s18 }
 0x113   :  { %p3188_p10 = por %p3187_p9, %p3186_p8 }
 0x115   :  { %p3189_p11 = pnand %p3188_p10, %p3182_p7 }
 0x117   :  { %3192 = shalt.err (!%p3189_p11)
}
 0x118   :  { %246 = dma.hbm_to_vmem [thread:$0]  %s3471_s6, 16, %s244_s21, [#allocation17]  }
 0x119   :  { %s3308_s3 = smov [#allocation21]   ;;  %s3309_s20 = smov [#allocation22]  }
 0x11a   :  { %s267_s27 = sshll.u32 %s3308_s3, 4  ;;  %s279_s23 = sshll.u32 %s3309_s20, 4  ;;  %s268_s27 = int_to_ptr.vmem [resolvable:$true] %s267_s27  ;;  %s280_s23 = int_to_ptr.vmem [resolvable:$true] %s279_s23 }
 0x11b   :  { %s3193_s26 = scalar_lea.hbm %s3491_s17, 16 }
 0x11c   :  { %p3194_p12 = scmp.ne.s32.totalorder %s3491_s17, %s3193_s26  ;;  %p3197_p13 = scmp.lt.u32.totalorder %s3193_s26, %s3491_s17 }
 0x11e   :  { %p3199_p0 = pnand %p3197_p13, %p3194_p12 }
 0x120   :  { %3202 = shalt.err (!%p3199_p0)
}
 0x121   :  { %s3203_s28 = scalar_lea.vmem %s268_s27, 16  ;;  %s3207_s5 = scalar_lea.vmem %s268_s27, 32 }
 0x122   :  { %p3204_p1 = scmp.ne.s32.totalorder %s268_s27, %s3203_s28  ;;  %p3208_p2 = scmp.lt.s32.totalorder %s268_s27, %s268_s27 }
 0x123   :  { %p3209_p3 = scmp.lt.s32.totalorder %s3207_s5, %s3203_s28 }
 0x125   :  { %p3210_p4 = por %p3209_p3, %p3208_p2 }
 0x127   :  { %p3211_p5 = pnand %p3210_p4, %p3204_p1 }
 0x129   :  { %3214 = shalt.err (!%p3211_p5)
}
 0x12a   :  { %270 = dma.hbm_to_vmem [thread:$0]  %s3491_s17, 16, %s268_s27, [#allocation20]  }
 0x12b   :  { %s3215_s6 = scalar_lea.hbm %s3501_s24, 16 }
 0x12c   :  { %p3216_p6 = scmp.ne.s32.totalorder %s3501_s24, %s3215_s6  ;;  %p3219_p7 = scmp.lt.u32.totalorder %s3215_s6, %s3501_s24 }
 0x12e   :  { %p3221_p8 = pnand %p3219_p7, %p3216_p6 }
 0x130   :  { %3224 = shalt.err (!%p3221_p8)
}
 0x131   :  { %s3225_s30 = scalar_lea.vmem %s280_s23, 16  ;;  %s3229_s1 = scalar_lea.vmem %s280_s23, 32 }
 0x132   :  { %p3226_p9 = scmp.ne.s32.totalorder %s280_s23, %s3225_s30  ;;  %p3230_p10 = scmp.lt.s32.totalorder %s280_s23, %s280_s23 }
 0x133   :  { %p3231_p11 = scmp.lt.s32.totalorder %s3229_s1, %s3225_s30 }
 0x135   :  { %p3232_p12 = por %p3231_p11, %p3230_p10 }
 0x137   :  { %p3233_p13 = pnand %p3232_p12, %p3226_p9 }
 0x139   :  { %3236 = shalt.err (!%p3233_p13)
}
 0x13a   :  { %282 = dma.hbm_to_vmem [thread:$0]  %s3501_s24, 16, %s280_s23, [#allocation23]  }
 0x13b   :  { %3237 = dma.done.wait [#allocation3], 128  }
 0x13c   :  { %3238 = vsyncadd [#allocation3], 4294967168 }
 0x13d   :  { %3239 = dma.done.wait [#allocation5], 256  }
 0x13e   :  { %3240 = vsyncadd [#allocation5], 4294967040 }
 0x13f   :  { %3241 = dma.done.wait [#allocation8], 144  }
 0x140   :  { %3242 = vsyncadd [#allocation8], 4294967152 }
 0x141   :  { %3243 = dma.done.wait [#allocation11], 32  }
 0x142   :  { %3244 = vsyncadd [#allocation11], 4294967264 }
 0x143   :  { %3245 = dma.done.wait [#allocation14], 32  }
 0x144   :  { %3246 = vsyncadd [#allocation14], 4294967264 }
 0x145   :  { %3247 = dma.done.wait [#allocation17], 32  }
 0x146   :  { %3248 = vsyncadd [#allocation17], 4294967264 }
 0x147   :  { %3249 = dma.done.wait [#allocation20], 32  }
 0x148   :  { %3250 = vsyncadd [#allocation20], 4294967264 }
 0x149   :  { %3251 = dma.done.wait [#allocation23], 16  }
 0x14a   :  { %3252 = vsyncadd [#allocation23], 4294967280  ;;  %s3979_s17 = sld [smem:[#allocation33_spill]]  ;;  %v3310_v0 = vmov 0.0   ;;  %vm3311_vm0 = vmmov 0   ;;  %vm449_vm1 = vcmask 1044480   ;;  %v542_v36 = vlaneseq }
 0x14b   :  { %2583 = vmatprep.subr.mxu1 %v3310_v0  ;;  %2585 = vmatprep.mubr.msk.f32.mxu1 %vm3311_vm0, %v3310_v0  ;;  %vm439_vm2 = vcmask 39936   ;;  %vm354_vm3 = vcmask 1045504   ;;  %v431_v1 = vld [vmem:[#allocation7] sm:$0x1f]  ;;  %s3980_s24 = sld [smem:[#allocation36_spill]]  ;;  %vm350_vm4 = vcmask 48128  }
 0x14c   :  { %2578 = vmatprep.subr.mxu0 %v3310_v0  ;;  %2580 = vmatprep.mubr.msk.f32.mxu0 %vm3311_vm0, %v3310_v0  ;;  %v342_v3 = vld [vmem:[#allocation6] sm:$0x3f]  ;;  %v335_v4 = vld [vmem:[#allocation2] sm:$0x3f]  ;;  %s3981_s0 = sld [smem:[#allocation38_spill]]  ;;  %v3312_v14 = vmov 2  }
 0x14d   :  { %2584 = vmatpush3.msk.msra.mxu1 %vm449_vm1, %v431_v1  ;;  %2579 = vmatpush3.msk.msra.mxu0 %vm354_vm3, %v342_v3  ;;  %v3313_v15 = vmov 1   ;;  %v3314_v16 = vmov 3   ;;  %v3315_v17 = vmov 0   ;;  %v3316_v18 = vmov 4   ;;  %v2459_v19 = vld [vmem:[#allocation9] ss:$0 sm:$0xff] }
 0x14e   :  { %2581 = vmatmul.mubr.msk.f32.vlgmr.msra.gmra.mrb[0].mxu0 %vm350_vm4, %v335_v4  ;;  %2896 = vset.pattern.permute.xlu1 %v3312_v14  ;;  %vm552_vm5 = vcmask 130048   ;;  %s3982_s2 = sld [smem:[#allocation34_spill]]  ;;  %s3983_s25 = sld [smem:[#allocation37_spill]]  ;;  %v3661_v37 = vshrl.u32 %v542_v36, 7  ;;  %v3320_v63 = vmov 0.0|0.0   ;;  %vm769_vm6 = vcmask 195584  }
 0x14f   :  { %626 = vmatprep.mubr.f32.mxu0 %v3310_v0  ;;  %2895 = vset.pattern.permute.xlu0 %v3313_v15  ;;  %s3317_s7 = smov 64   ;;  %s3318_s10 = smov 96   ;;  %vm1123_vm7 = vcmask 1043456   ;;  %vm3321_vm8 = vmmov 1   ;;  %vm1119_vm10 = vcmask 97280   ;;  %vm1211_vm11 = vcmask 261120  }
 0x150   :  { %v336_v2 = vld [vmem:[%s3979_s17] sm:$0xff]  ;;  %v337_v5 = vld [vmem:[%s3979_s17 + $0x8] sm:$0xff]  ;;  %v338_v6 = vld [vmem:[%s3979_s17 + $0x10] sm:$0xff]  ;;  %v544_v39 = vsub.s32 0, %v3661_v37  ;;  %s3319_s9 = smov 32   ;;  %2750 = vmatprep.subr.bf16.mxu1 %v3320_v63  ;;  %s3984_s8 = sld [smem:[#allocation39_spill]] }
 0x151   :  { %2586 = vmatmul.mubr.msk.f32.vlgmr.msra.gmra.mrb[0].mxu1 %vm439_vm2, %v336_v2  ;;  %v537_v7 = vld [vmem:[%s3980_s24 + $0x8] sm:$0xff]  ;;  %v539_v8 = vld [vmem:[%s3980_s24 + $0x18] sm:$0xff]  ;;  %v536_v10 = vld [vmem:[%s3980_s24] sm:$0xff]  ;;  %691 = vperm.xlu1 %2896, %v336_v2   ;;  %s3985_s11 = sld [smem:[#allocation41_spill]]  ;;  %s3986_s21 = sld [smem:[#allocation40_spill]]  ;;  %vm2385_vm12 = vcmask 259072  }
 0x152   :  { %2588 = vmatprep.mubr.msk.f32.mxu1 %vm3311_vm0, %v3310_v0  ;;  %v2746_v9 = vpack.c.bf16 %v539_v8, %v537_v7  ;;  %v538_v11 = vld [vmem:[%s3980_s24 + $0x10] sm:$0xff]  ;;  %v843_v13 = vld [vmem:[%s3981_s0] sm:$0x1f]  ;;  %661 = vperm.xlu0 %2895, %v336_v2   ;;  %s3987_s15 = sld [smem:[#allocation45_spill]]  ;;  %s3988_s29 = sld [smem:[#allocation42_spill]]  ;;  %vm2759_vm9 = vmpackc.low %vm1123_vm7, %vm3321_vm8  ;;  %vm2224_vm14 = vcmask 244736  }
 0x153   :  { %v2748_v12 = vpack.c.bf16 %v538_v11, %v536_v10  ;;  %s3989_s16 = sld [smem:[#allocation35_spill]]  ;;  %s3990_s4 = sld [smem:[#allocation32_spill]]  ;;  %vm2820_vm13 = vmpackc.low %vm354_vm3, %vm3321_vm8  ;;  %vm2382_vm15 = vcmask 78848  }
 0x154   :  { %2747 = vmatprep.subr.bf16.mxu0 %v2746_v9  ;;  %v3649_v34 = vld [vmem:[%s3982_s2] sm:$0xff]  ;;  %v3655_v35 = vld [vmem:[%s3982_s2 + $0x8] sm:$0xf]  ;;  %s3991_s18 = sld [smem:[#allocation46_spill]]  ;;  %s3992_s22 = sld [smem:[#allocation47_spill]] }
 0x155   :  { %2589 = vmatmul.mubr.msk.f32.gmra.mrb[2].mxu1 %vm439_vm2, %v337_v5  ;;  %2749 = vmatpush1.bf16.msra.mxu0 %v2748_v12  ;;  %v3665_v41 = vld [vmem:[%s3983_s25] sm:$0x3]  ;;  %s3993_s3 = sld [smem:[#allocation43_spill]]  ;;  %s3995_s27 = sld [smem:[#allocation44_spill]] }
 0x156   :  { %2591 = vmatprep.mubr.msk.f32.mxu1 %vm3311_vm0, %v3310_v0  ;;  %2603 = vmatprep.subr.msk.mxu0 %vm449_vm1, %v843_v13  ;;  %v545_v42 = vrot.slane %v3665_v41, %v544_v39  ;;  %s3996_s20 = sld [smem:[#allocation48_spill]]  ;;  %s3997_s23 = sld [smem:[#allocation50_spill]] }
 0x157   :  { %695 = vperm.xlu1 %2896, %v337_v5   ;;  %665 = vperm.xlu0 %2895, %v337_v5   ;;  %s3998_s26 = sld [smem:[#allocation53_spill]]  ;;  %s3999_s28 = sld [smem:[#allocation51_spill]] }
 0x158   :  { %s4000_s5 = sld [smem:[#allocation52_spill]]  ;;  %s4001_s6 = sld [smem:[#allocation55_spill]] }
 0x159   :  { %2592 = vmatmul.mubr.msk.f32.gmra.mrb[4].mxu1 %vm439_vm2, %v338_v6  ;;  %s4002_s30 = sld [smem:[#allocation54_spill]]  ;;  %s4003_s1 = sld [smem:[#allocation56_spill]] }
 0x15a   :  { %2600 = vmatprep.mubr.msk.f32.mxu1 %vm3311_vm0, %v3310_v0  ;;  %s4004_s17 = sld [smem:[#allocation57_spill]] }
 0x15b   :  { %2898 = vset.pattern.permute.xlu1 %v3314_v16  ;;  %2897 = vset.pattern.permute.xlu0 %v3314_v16 }
 0x15c   :  { %725 = vperm.xlu1 %2898, %v337_v5   ;;  %721 = vperm.xlu0 %2897, %v336_v2  }
 0x160   :  { %2899 = vset.pattern.permute.xlu1 %v3313_v15  ;;  %2900 = vset.pattern.permute.xlu0 %v3312_v14 }
 0x161   :  { %669 = vperm.xlu1 %2899, %v338_v6   ;;  %699 = vperm.xlu0 %2900, %v338_v6  }
 0x165   :  { %2901 = vset.pattern.permute.xlu1 %v3314_v16  ;;  %2903 = vset.pattern.permute.xlu0 %v3315_v17 }
 0x166   :  { %729 = vperm.xlu1 %2901, %v338_v6   ;;  %650 = vperm.xlu0 %2903, %v337_v5  }
 0x16a   :  { %2902 = vset.pattern.permute.xlu1 %v3315_v17  ;;  %2905 = vset.pattern.permute.xlu0 %v3316_v18 }
 0x16b   :  { %646 = vperm.xlu1 %2902, %v336_v2   ;;  %755 = vperm.xlu0 %2905, %v337_v5  }
 0x16f   :  { %654 = vperm.xlu1 %2902, %v338_v6   ;;  %759 = vperm.xlu0 %2905, %v338_v6  }
 0x173   :  { %2904 = vset.pattern.permute.xlu1 %v3316_v18  ;;  %2906 = vset.pattern.permute.xlu0 %v3313_v15 }
 0x174   :  { %751 = vperm.xlu1 %2904, %v336_v2  }
 0x178   :  { %2907 = vset.pattern.permute.xlu1 %v3313_v15 }
 0x1d0   :  { %v692_v40 = vpop.permute.xlu1 %691 }
 0x1d1   :  { %v662_v38 = vpop.permute.xlu0 %661 }
 0x1d6   :  { %v666_v43 = vpop.permute.xlu0 %665  ;;  %v696_v44 = vpop.permute.xlu1 %695 }
 0x1db   :  { %v722_v50 = vpop.permute.xlu0 %721  ;;  %v726_v54 = vpop.permute.xlu1 %725 }
 0x1e0   :  { %v700_v60 = vpop.permute.xlu0 %699  ;;  %v670_v4 = vpop.permute.xlu1 %669 }
 0x1e5   :  { %v730_v6 = vpop.permute.xlu1 %729  ;;  %v651_v10 = vpop.permute.xlu0 %650 }
 0x1ea   :  { %v647_v8 = vpop.permute.xlu1 %646  ;;  %v756_v12 = vpop.permute.xlu0 %755 }
 0x1ee   :  { %v655_v9 = vpop.permute.xlu1 %654 }
 0x1f3   :  { %v752_v11 = vpop.permute.xlu1 %751 }
 0x221   :  { %v3641_v23 = vpop.f32.mrb[0].mxu0 }
 0x222   :  { %v2582_v24 = vpop.f32.mrb[1].mxu0 }
 0x224   :  { %v519_v20 = vpop.f32.mrb[0].mxu1 }
 0x225   :  { %v520_v21 = vadd.f32 %v2459_v19, %v519_v20  ;;  %v2587_v22 = vpop.f32.mrb[1].mxu1 }
 0x227   :  { %v533_v25 = vmax.f32 %v520_v21, 0.0 }
 0x228   :  { %v524_v26 = vpop.f32.mrb[2].mxu1 }
 0x229   :  { %v525_v27 = vadd.f32 %v2459_v19, %v524_v26  ;;  %2464 = vmatmul.mubr.msk.f32.vlgmr.msra.gmra.mrb[2].mxu0 %vm552_vm5, %v533_v25  ;;  %v2590_v28 = vpop.f32.mrb[3].mxu1 }
 0x22a   :  { %632 = vmatprep.mubr.f32.mxu0 %v3310_v0  ;;  %2604 = vmatpush3.msk.msra.mxu0 %vm449_vm1, %v843_v13  ;;  %vm2302_vm1 = vcmask 23552  }
 0x22b   :  { %v534_v29 = vmax.f32 %v525_v27, 0.0  ;;  %2761 = vmatprep.subr.bf16.mxu0 %v3320_v63 }
 0x22c   :  { %v529_v30 = vpop.f32.mrb[4].mxu1 }
 0x22d   :  { %2465 = vmatmul.mubr.msk.f32.gmra.mrb[4].mxu0 %vm552_vm5, %v534_v29  ;;  %v530_v31 = vadd.f32 %v2459_v19, %v529_v30  ;;  %v2593_v32 = vpop.f32.mrb[5].mxu1 }
 0x22e   :  { %638 = vmatprep.mubr.f32.mxu0 %v3310_v0 }
 0x22f   :  { %v535_v33 = vmax.f32 %v530_v31, 0.0 }
 0x231   :  { %2466 = vmatmul.mubr.msk.f32.gmra.mrb[6].mxu0 %vm552_vm5, %v535_v33 }
 0x232   :  { %2605 = vmatprep.mubr.msk.f32.mxu0 %vm439_vm2, %v3649_v34 }
 0x235   :  { %2606 = vmatmul.mubr.msk.f32.vlgmr.msra.gmra.mrb[8].mxu0 %vm439_vm2, %v3655_v35 }
 0x236   :  { %2623 = vmatprep.mubr.msk.f32.mxu0 %vm3311_vm0, %v3310_v0 }
 0x2fc   :  { %v628_v45 = vpop.f32.mrb[2].mxu0 }
 0x2fd   :  { %v3670_v46 = vadd.f32 %v628_v45, %v545_v42  ;;  %v3672_v47 = vpop.f32.mrb[3].mxu0 }
 0x2ff   :  { %v702_v48 = vmul.f32 %v692_v40, %v3670_v46  ;;  %v672_v49 = vmul.f32 %v662_v38, %v3670_v46  ;;  %v732_v55 = vmul.f32 %v722_v50, %v3670_v46  ;;  %v657_v15 = vmul.f32 %v647_v8, %v3670_v46  ;;  %v2468_v46 = vld [vmem:[#allocation10] ss:$0 sm:$0xff] }
 0x300   :  { %v634_v51 = vpop.f32.mrb[4].mxu0  ;;  %v937_v50 = vld [vmem:[%s3984_s8] sm:$0xff] }
 0x301   :  { %v3676_v52 = vadd.f32 %v634_v51, %v545_v42  ;;  %708 = vrot.lane.b32.xlu0 %v702_v48, %s3317_s7  ;;  %678 = vrot.lane.b32.xlu1 %v672_v49, %s3318_s10  ;;  %v636_v53 = vpop.f32.mrb[5].mxu0  ;;  %v940_v48 = vld [vmem:[%s3984_s8 + $0x18] sm:$0xff]  ;;  %v939_v51 = vld [vmem:[%s3984_s8 + $0x10] sm:$0xff] }
 0x303   :  { %v733_v56 = vmul.f32 %v726_v54, %v3676_v52  ;;  %v673_v61 = vmul.f32 %v666_v43, %v3676_v52  ;;  %v703_v2 = vmul.f32 %v696_v44, %v3676_v52  ;;  %v658_v22 = vmul.f32 %v651_v10, %v3676_v52 }
 0x304   :  { %v640_v57 = vpop.f32.mrb[6].mxu0 }
 0x305   :  { %738 = vrot.lane.b32.xlu1 %v732_v55, %s3319_s9  ;;  %740 = vrot.lane.b32.xlu0 %v733_v56, %s3319_s9  ;;  %v3684_v58 = vadd.f32 %v640_v57, %v545_v42  ;;  %v3686_v59 = vpop.f32.mrb[7].mxu0  ;;  %v3746_v57 = vld [vmem:[%s3985_s11] sm:$0x3f] }
 0x307   :  { %v704_v62 = vmul.f32 %v700_v60, %v3684_v58  ;;  %v674_v5 = vmul.f32 %v670_v4, %v3684_v58  ;;  %v734_v7 = vmul.f32 %v730_v6, %v3684_v58 }
 0x308   :  { %v3694_v1 = vpop.f32.mrb[8].mxu0 }
 0x309   :  { %680 = vrot.lane.b32.xlu1 %v673_v61, %s3318_s10  ;;  %712 = vrot.lane.b32.xlu0 %v704_v62, %s3317_s7  ;;  %v3697_v3 = vpop.f32.mrb[9].mxu0  ;;  %v932_v60 = vadd.f32 %v3694_v1, %v2468_v46 }
 0x30a   :  { %v927_v54 = vadd.f32 %v2468_v46, %v3697_v3 }
 0x30b   :  { %v936_v61 = vmax.f32 %v932_v60, 0.0  ;;  %v428_v60 = vld [vmem:[%s3990_s4] sm:$0x3f] }
 0x30d   :  { %710 = vrot.lane.b32.xlu1 %v703_v2, %s3317_s7  ;;  %1047 = vperm.xlu0 %2906, %v3649_v34   ;;  %v941_v2 = vld [vmem:[%s3986_s21] sm:$0x3] }
 0x30e   :  { %v946_v3 = vrot.slane %v941_v2, %v544_v39 }
 0x311   :  { %682 = vrot.lane.b32.xlu1 %v674_v5, %s3318_s10  ;;  %2909 = vset.pattern.permute.xlu0 %v3312_v14 }
 0x312   :  { %1071 = vperm.xlu0 %2909, %v3655_v35  }
 0x315   :  { %742 = vrot.lane.b32.xlu1 %v734_v7, %s3319_s9 }
 0x316   :  { %2911 = vset.pattern.permute.xlu0 %v3315_v17 }
 0x317   :  { %1037 = vperm.xlu0 %2911, %v3649_v34  }
 0x319   :  { %1051 = vperm.xlu1 %2907, %v3655_v35  }
 0x31b   :  { %2914 = vset.pattern.permute.xlu0 %v3316_v18 }
 0x31c   :  { %1111 = vperm.xlu0 %2914, %v3655_v35  }
 0x31d   :  { %2908 = vset.pattern.permute.xlu1 %v3312_v14  ;;  %v548_v14 = vsub.s32 1, %v3661_v37 }
 0x31e   :  { %1067 = vperm.xlu1 %2908, %v3649_v34  }
 0x322   :  { %2910 = vset.pattern.permute.xlu1 %v3314_v16  ;;  %v760_v16 = vpop.permute.xlu0 %759 }
 0x323   :  { %1087 = vperm.xlu1 %2910, %v3649_v34  }
 0x327   :  { %1091 = vperm.xlu1 %2910, %v3655_v35  }
 0x32b   :  { %2912 = vset.pattern.permute.xlu1 %v3315_v17  ;;  %v549_v17 = vrot.slane %v3665_v41, %v548_v14 }
 0x32c   :  { %1041 = vperm.xlu1 %2912, %v3655_v35   ;;  %v659_v35 = vmul.f32 %v655_v9, %v3684_v58  ;;  %v2755_v58 = vpack.c.bf16 %v939_v51, %v937_v50 }
 0x32d   :  { %v3728_v25 = vadd.f32 %v3672_v47, %v549_v17  ;;  %v3730_v26 = vadd.f32 %v636_v53, %v549_v17  ;;  %v3736_v38 = vadd.f32 %v3686_v59, %v549_v17  ;;  %v938_v47 = vld [vmem:[%s3984_s8 + $0x8] sm:$0xff]  ;;  %v935_v59 = vmax.f32 %v927_v54, 0.0  ;;  %v1202_v54 = vld [vmem:[%s3987_s15 + $0x10] sm:$0xff] }
 0x32e   :  { %v2753_v55 = vpack.c.bf16 %v940_v48, %v938_v47  ;;  %v1201_v17 = vld [vmem:[%s3987_s15 + $0x8] sm:$0xff] }
 0x32f   :  { %v762_v32 = vmul.f32 %v752_v11, %v3728_v25  ;;  %v763_v33 = vmul.f32 %v756_v12, %v3730_v26  ;;  %v764_v52 = vmul.f32 %v760_v16, %v3736_v38 }
 0x330   :  { %2913 = vset.pattern.permute.xlu1 %v3316_v18 }
 0x331   :  { %1107 = vperm.xlu1 %2913, %v3649_v34  }
 0x373   :  { %v679_v13 = vpop.permute.xlu1 %678  ;;  %v709_v18 = vpop.permute.xlu0 %708 }
 0x374   :  { %v687_v20 = vadd.f32 %v679_v13, %v657_v15 }
 0x376   :  { %v717_v24 = vadd.f32 %v709_v18, %v687_v20  ;;  %v1200_v20 = vld [vmem:[%s3987_s15] sm:$0xff] }
 0x377   :  { %v739_v19 = vpop.permute.xlu1 %738  ;;  %v741_v31 = vpop.permute.xlu0 %740 }
 0x378   :  { %v747_v29 = vadd.f32 %v739_v19, %v717_v24 }
 0x37a   :  { %v765_v40 = vadd.f32 %v762_v32, %v747_v29 }
 0x37b   :  { %v681_v21 = vpop.permute.xlu1 %680  ;;  %v713_v43 = vpop.permute.xlu0 %712 }
 0x37c   :  { %v688_v27 = vadd.f32 %v681_v21, %v658_v22  ;;  %v2762_v21 = vpack.c.bf16 %v1201_v17, %v1200_v20 }
 0x37e   :  { %2763 = vmatpush3.bf16.msra.mxu0 %v2762_v21 }
 0x37f   :  { %v711_v28 = vpop.permute.xlu1 %710  ;;  %2764 = vmatprep.subr.bf16.mxu0 %v3320_v63 }
 0x380   :  { %v718_v30 = vadd.f32 %v711_v28, %v688_v27 }
 0x382   :  { %v748_v34 = vadd.f32 %v741_v31, %v718_v30  ;;  %v950_v30 = vrot.slane %v941_v2, %v548_v14  ;;  %v1286_v2 = vld [vmem:[%s3991_s18 + $0x8] sm:$0xff] }
 0x383   :  { %v683_v36 = vpop.permute.xlu1 %682 }
 0x384   :  { %v766_v41 = vadd.f32 %v763_v33, %v748_v34  ;;  %v689_v42 = vadd.f32 %v683_v36, %v659_v35 }
 0x386   :  { %v2751_v44 = vpack.c.bf16 %v766_v41, %v765_v40  ;;  %v719_v45 = vadd.f32 %v713_v43, %v689_v42 }
 0x387   :  { %v743_v49 = vpop.permute.xlu1 %742 }
 0x388   :  { %v749_v53 = vadd.f32 %v743_v49, %v719_v45  ;;  %2752 = vmatpush3.bf16.msra.mxu1 %v2751_v44 }
 0x389   :  { %2598 = vmatprep.subr.mxu1 %v3310_v0 }
 0x38a   :  { %v767_v56 = vadd.f32 %v764_v52, %v749_v53  ;;  %v1118_v53 = vld [vmem:[%s3988_s29] sm:$0x3f] }
 0x38c   :  { %2599 = vmatpush3.msra.mxu1 %v767_v56  ;;  %v1048_v7 = vpop.permute.xlu0 %1047 }
 0x38d   :  { %2601 = vmatmul.mubr.msk.f32.vlgmr.msra.gmra.mrb[6].mxu1 %vm769_vm6, %v3746_v57  ;;  %2754 = vmatprep.subr.bf16.mxu1 %v2753_v55  ;;  %v1203_v55 = vld [vmem:[%s3987_s15 + $0x18] sm:$0xff] }
 0x38e   :  { %2756 = vmatpush1.bf16.msra.mxu1 %v2755_v58  ;;  %1023 = vmatprep.mubr.f32.mxu1 %v3310_v0  ;;  %v2765_v56 = vpack.c.bf16 %v1203_v55, %v1202_v54  ;;  %v2456_v58 = vld [vmem:[%s3989_s16] ss:$0 sm:$0xff] }
 0x38f   :  { %2757 = vmatprep.subr.bf16.mxu1 %v3320_v63 }
 0x390   :  { %2766 = vmatpush3.bf16.msra.mxu0 %v2765_v56 }
 0x391   :  { %2472 = vmatmul.mubr.msk.f32.vlgmr.msra.gmra.mrb[8].mxu1 %vm552_vm5, %v935_v59  ;;  %v1072_v39 = vpop.permute.xlu0 %1071  ;;  %2767 = vmatprep.subr.bf16.mxu0 %v3320_v63  ;;  %v3782_v59 = vadd.f32 %v2456_v58, %v3641_v23  ;;  %v3794_v23 = vld [vmem:[#allocation4] sm:$0x3f] }
 0x392   :  { %1029 = vmatprep.mubr.f32.mxu1 %v3310_v0 }
 0x395   :  { %2473 = vmatmul.mubr.msk.f32.gmra.mrb[10].mxu1 %vm552_vm5, %v936_v61  ;;  %v429_v61 = vadd.f32 %v428_v60, %v3782_v59 }
 0x396   :  { %2612 = vmatprep.mubr.msk.f32.mxu1 %vm3311_vm0, %v3310_v0  ;;  %v1038_v27 = vpop.permute.xlu0 %1037 }
 0x398   :  { %v1052_v62 = vpop.permute.xlu1 %1051 }
 0x39b   :  { %v1112_v29 = vpop.permute.xlu0 %1111 }
 0x39d   :  { %v1068_v4 = vpop.permute.xlu1 %1067 }
 0x3a2   :  { %v1088_v13 = vpop.permute.xlu1 %1087 }
 0x3a6   :  { %v1092_v18 = vpop.permute.xlu1 %1091 }
 0x3ab   :  { %v1042_v24 = vpop.permute.xlu1 %1041 }
 0x3b0   :  { %v1108_v28 = vpop.permute.xlu1 %1107 }
 0x464   :  { %v1025_v5 = vpop.f32.mrb[8].mxu1 }
 0x465   :  { %v1026_v1 = vadd.f32 %v1025_v5, %v946_v3  ;;  %v1027_v6 = vpop.f32.mrb[9].mxu1 }
 0x466   :  { %v1028_v34 = vadd.f32 %v1027_v6, %v950_v30 }
 0x467   :  { %v1074_v8 = vmul.f32 %v1068_v4, %v1026_v1  ;;  %v1054_v9 = vmul.f32 %v1048_v7, %v1026_v1  ;;  %v1094_v15 = vmul.f32 %v1088_v13, %v1026_v1  ;;  %v1044_v31 = vmul.f32 %v1038_v27, %v1026_v1  ;;  %v1287_v7 = vld [vmem:[%s3991_s18 + $0x10] sm:$0xff] }
 0x468   :  { %v1031_v10 = vpop.f32.mrb[10].mxu1  ;;  %v1114_v42 = vmul.f32 %v1108_v28, %v1028_v34  ;;  %v1401_v34 = vld [vmem:[%s3992_s22 + $0x18] sm:$0xff] }
 0x469   :  { %v1032_v11 = vadd.f32 %v1031_v10, %v946_v3  ;;  %v1033_v12 = vpop.f32.mrb[11].mxu1  ;;  %1078 = vrot.lane.b32.xlu0 %v1074_v8, %s3317_s7  ;;  %1058 = vrot.lane.b32.xlu1 %v1054_v9, %s3318_s10  ;;  %v1288_v8 = vld [vmem:[%s3991_s18 + $0x18] sm:$0xff] }
 0x46a   :  { %v1034_v47 = vadd.f32 %v1033_v12, %v950_v30  ;;  %v2771_v9 = vpack.c.bf16 %v1288_v8, %v1287_v7  ;;  %v2478_v12 = vld [vmem:[#allocation13] ss:$0 sm:$0xff] }
 0x46b   :  { %v1055_v16 = vmul.f32 %v1052_v62, %v1032_v11  ;;  %v1075_v19 = vmul.f32 %v1072_v39, %v1032_v11  ;;  %v1095_v22 = vmul.f32 %v1092_v18, %v1032_v11  ;;  %v1045_v45 = vmul.f32 %v1042_v24, %v1032_v11  ;;  %v1285_v62 = vld [vmem:[%s3991_s18] sm:$0xff] }
 0x46c   :  { %v1115_v14 = vmul.f32 %v1112_v29, %v1034_v47  ;;  %v2768_v1 = vpack.c.bf16 %v1286_v2, %v1285_v62  ;;  %v2476_v39 = vld [vmem:[#allocation12] ss:$0 sm:$0xff] }
 0x46d   :  { %1098 = vrot.lane.b32.xlu0 %v1094_v15, %s3319_s9  ;;  %1060 = vrot.lane.b32.xlu1 %v1055_v16, %s3318_s10  ;;  %v1398_v30 = vld [vmem:[%s3992_s22] sm:$0xff] }
 0x471   :  { %1080 = vrot.lane.b32.xlu1 %v1075_v19, %s3317_s7 }
 0x475   :  { %1100 = vrot.lane.b32.xlu1 %v1095_v22, %s3319_s9 }
 0x4db   :  { %v1079_v32 = vpop.permute.xlu0 %1078  ;;  %v1059_v33 = vpop.permute.xlu1 %1058 }
 0x4dc   :  { %v1064_v35 = vadd.f32 %v1059_v33, %v1044_v31  ;;  %v1399_v31 = vld [vmem:[%s3992_s22 + $0x8] sm:$0xff] }
 0x4dd   :  { %v2774_v33 = vpack.c.bf16 %v1399_v31, %v1398_v30  ;;  %v1697_v30 = vld [vmem:[%s3996_s20] sm:$0xff]  ;;  %v1698_v31 = vld [vmem:[%s3996_s20 + $0x8] sm:$0xff] }
 0x4de   :  { %v1084_v36 = vadd.f32 %v1079_v32, %v1064_v35  ;;  %v1400_v32 = vld [vmem:[%s3992_s22 + $0x10] sm:$0xff] }
 0x4df   :  { %v1099_v40 = vpop.permute.xlu0 %1098  ;;  %v1061_v41 = vpop.permute.xlu1 %1060  ;;  %v2777_v35 = vpack.c.bf16 %v1401_v34, %v1400_v32  ;;  %v1699_v34 = vld [vmem:[%s3996_s20 + $0x10] sm:$0xff] }
 0x4e0   :  { %v1104_v43 = vadd.f32 %v1099_v40, %v1084_v36  ;;  %v1065_v48 = vadd.f32 %v1061_v41, %v1045_v45 }
 0x4e2   :  { %v1116_v44 = vadd.f32 %v1114_v42, %v1104_v43 }
 0x4e3   :  { %v1081_v46 = vpop.permute.xlu1 %1080 }
 0x4e4   :  { %v1085_v49 = vadd.f32 %v1081_v46, %v1065_v48  ;;  %v1484_v46 = vld [vmem:[%s3993_s3] sm:$0xff]  ;;  %v1485_v48 = vld [vmem:[%s3993_s3 + $0x8] sm:$0xff] }
 0x4e7   :  { %v1101_v37 = vpop.permute.xlu1 %1100 }
 0x4e8   :  { %v1105_v50 = vadd.f32 %v1101_v37, %v1085_v49  ;;  %v1486_v49 = vld [vmem:[%s3993_s3 + $0x10] sm:$0xff] }
 0x4ea   :  { %v1117_v51 = vadd.f32 %v1115_v14, %v1105_v50 }
 0x4ec   :  { %v2758_v52 = vpack.c.bf16 %v1117_v51, %v1116_v44 }
 0x4ee   :  { %2760 = vmatpush3.bf16.msk.msra.mxu1 %vm2759_vm9, %v2758_v52 }
 0x4ef   :  { %2773 = vmatprep.subr.bf16.mxu1 %v3320_v63 }
 0x4f1   :  { %2613 = vmatmul.mubr.msk.f32.vlgmr.msra.gmra.mrb[6].mxu1 %vm1119_vm10, %v1118_v53 }
 0x4f2   :  { %2645 = vmatprep.mubr.msk.f32.mxu1 %vm3311_vm0, %v3310_v0  ;;  %2775 = vmatpush3.bf16.msra.mxu1 %v2774_v33  ;;  %v2783_v33 = vpack.c.bf16 %v1698_v31, %v1697_v30  ;;  %v2220_v30 = vld [vmem:[%s4001_s6 + $0x8] sm:$0xff]  ;;  %v2495_v31 = vld [vmem:[#allocation21] ss:$0 sm:$0xff] }
 0x4f3   :  { %2776 = vmatprep.subr.bf16.mxu1 %v3320_v63 }
 0x4f6   :  { %2778 = vmatpush3.bf16.msra.mxu1 %v2777_v35  ;;  %v1700_v35 = vld [vmem:[%s3996_s20 + $0x18] sm:$0xff] }
 0x4f7   :  { %2779 = vmatprep.subr.bf16.mxu1 %v3320_v63 }
 0x5c4   :  { %v1193_v3 = vpop.f32.mrb[6].mxu1 }
 0x5c5   :  { %v2822_v4 = vadd.f32 %v1193_v3, %v429_v61  ;;  %v2614_v5 = vpop.f32.mrb[7].mxu1 }
 0x5c7   :  { %v1199_v6 = vmax.f32 %v2822_v4, 0.0 }
 0x5c9   :  { %2624 = vmatmul.mubr.msk.f32.vlgmr.msra.gmra.mrb[10].mxu0 %vm1211_vm11, %v1199_v6 }
 0x5ca   :  { %2769 = vmatpush3.bf16.msra.mxu0 %v2768_v1  ;;  %2634 = vmatprep.mubr.msk.f32.mxu0 %vm3311_vm0, %v3310_v0  ;;  %v3322_v1 = vmov 64  }
 0x5cb   :  { %2770 = vmatprep.subr.bf16.mxu0 %v3320_v63  ;;  %2915 = vset.pattern.permute.xlu0 %v3322_v1 }
 0x5cc   :  { %2916 = vset.pattern.permute.xlu1 %v3322_v1 }
 0x5ce   :  { %2772 = vmatpush3.bf16.msra.mxu0 %v2771_v9 }
 0x5cf   :  { %2648 = vmatprep.subr.mxu0 %v3310_v0 }
 0x5d1   :  { %2635 = vmatmul.mubr.msk.f32.vlgmr.msra.gmra.mrb[12].mxu0 %vm1211_vm11, %v3794_v23 }
 0x5d2   :  { %2650 = vmatprep.mubr.msk.f32.mxu0 %vm3311_vm0, %v3310_v0 }
 0x69c   :  { %v1281_v10 = vpop.f32.mrb[10].mxu0 }
 0x69d   :  { %v2625_v11 = vpop.f32.mrb[11].mxu0  ;;  %v1282_v19 = vadd.f32 %v2476_v39, %v1281_v10 }
 0x6a4   :  { %v1365_v13 = vpop.f32.mrb[12].mxu0 }
 0x6a5   :  { %v1366_v15 = vadd.f32 %v2478_v12, %v1365_v13  ;;  %v2636_v16 = vpop.f32.mrb[13].mxu0 }
 0x6a7   :  { %1377 = vrot.lane.b32.xlu0 %v1366_v15, %s3317_s7  ;;  %v1369_v20 = vadd.f32 %v1366_v15, %v1282_v19 }
 0x6a9   :  { %v2480_v17 = vmul.f32 -1.442695, %v1369_v20  ;;  %v2490_v20 = vld [vmem:[#allocation18] ss:$0 sm:$0xff] }
 0x6ab   :  { %2917 = vpow2.f32 %v2480_v17 }
 0x6b5   :  { %v2918_v18 = vpop.eup %2917 }
 0x6b6   :  { %v1373_v21 = vadd.f32 1.0, %v2918_v18 }
 0x6b8   :  { %2919 = vrcp.f32 %v1373_v21 }
 0x6c2   :  { %v2920_v22 = vpop.eup %2919 }
 0x6c3   :  { %v1387_v41 = vsub.f32 1.0, %v2920_v22 }
 0x719   :  { %v1378_v24 = vpop.permute.xlu0 %1377 }
 0x71a   :  { %v1380_v27 = vmul.f32 %v2920_v22, %v1378_v24 }
 0x71c   :  { %1382 = vrot.lane.b32.xlu1 %v1380_v27, %s3317_s7 }
 0x720   :  { %1393 = vrot.lane.b32.xlu1 %v3794_v23, %s3319_s9 }
 0x724   :  { %1581 = vrot.lane.b32.xlu1 %v3728_v25, %s3318_s10 }
 0x728   :  { %1585 = vrot.lane.b32.xlu1 %v3736_v38, %s3318_s10 }
 0x78e   :  { %v1383_v28 = vpop.permute.xlu1 %1382 }
 0x78f   :  { %v1385_v29 = vadd.f32 %v1383_v28, %v1282_v19 }
 0x791   :  { %2921 = vtanh.f32 %v1385_v29 }
 0x792   :  { %v3816_v40 = vpop.permute.xlu1 %1393 }
 0x793   :  { %v1396_v43 = vmul.f32 %v2920_v22, %v3816_v40  ;;  %v1606_v22 = vld [vmem:[%s3995_s27 + $0x8] sm:$0xff] }
 0x796   :  { %v1582_v37 = vpop.permute.xlu1 %1581 }
 0x79a   :  { %v1586_v62 = vpop.permute.xlu1 %1585 }
 0x79b   :  { %v2922_v36 = vpop.eup %2921 }
 0x79c   :  { %1389 = vrot.lane.b32.xlu0 %v2922_v36, %s3318_s10  ;;  %v2786_v36 = vpack.c.bf16 %v1700_v35, %v1699_v34 }
 0x80e   :  { %v1390_v42 = vpop.permute.xlu0 %1389 }
 0x80f   :  { %v1392_v44 = vmul.f32 %v1390_v42, %v1387_v41  ;;  %v2481_v42 = vld [vmem:[#allocation15] ss:$0 sm:$0xff] }
 0x811   :  { %v1397_v45 = vadd.f32 %v1396_v43, %v1392_v44 }
 0x813   :  { %1410 = vrot.lane.b32.xlu0 %v1397_v45, %s3318_s10 }
 0x817   :  { %1583 = vrot.lane.b32.xlu0 %v3730_v26, %s3318_s10 }
 0x885   :  { %v1411_v47 = vpop.permute.xlu0 %1410 }
 0x886   :  { %2386 = vst.msk [vmem:[%s3536_s12] sm:$0x3f] %vm2385_vm12, %v1411_v47  ;;  %2646 = vmatmul.mubr.msk.f32.vlgmr.msra.gmra.mrb[12].mxu1 %vm1211_vm11, %v1411_v47  ;;  %2649 = vmatpush3.msk.msra.mxu0 %vm354_vm3, %v1411_v47  ;;  %s3994_s12 = sld [smem:[#allocation49_spill]] }
 0x887   :  { %2651 = vmatmul.mubr.msk.f32.vlgmr.msra.gmra.mrb[14].mxu0 %vm350_vm4, %v1484_v46  ;;  %2788 = vmatprep.subr.bf16.mxu0 %v3320_v63  ;;  %v2488_v46 = vld [vmem:[#allocation16] ss:$0 sm:$0xff] }
 0x888   :  { %2653 = vmatprep.mubr.msk.f32.mxu0 %vm3311_vm0, %v3310_v0  ;;  %2665 = vmatprep.mubr.msk.f32.mxu1 %vm3311_vm0, %v3310_v0 }
 0x889   :  { %v1584_v55 = vpop.permute.xlu0 %1583 }
 0x88b   :  { %2654 = vmatmul.mubr.msk.f32.gmra.mrb[16].mxu0 %vm350_vm4, %v1485_v48 }
 0x88c   :  { %2656 = vmatprep.mubr.msk.f32.mxu0 %vm3311_vm0, %v3310_v0  ;;  %v1783_v6 = vld [vmem:[%s3994_s12] sm:$0xff]  ;;  %v1784_v7 = vld [vmem:[%s3994_s12 + $0x8] sm:$0xff]  ;;  %v1785_v8 = vld [vmem:[%s3994_s12 + $0x10] sm:$0xff] }
 0x88d   :  { %v2789_v9 = vpack.c.bf16 %v1784_v7, %v1783_v6  ;;  %v1786_v10 = vld [vmem:[%s3994_s12 + $0x18] sm:$0xff] }
 0x88e   :  { %v2792_v11 = vpack.c.bf16 %v1786_v10, %v1785_v8  ;;  %v2144_v10 = vld [vmem:[%s3998_s26 + $0x8] sm:$0xff] }
 0x88f   :  { %2657 = vmatmul.mubr.msk.f32.gmra.mrb[18].mxu0 %vm350_vm4, %v1486_v49 }
 0x890   :  { %2687 = vmatprep.mubr.msk.f32.mxu0 %vm3311_vm0, %v3310_v0  ;;  %2790 = vmatpush3.bf16.msra.mxu0 %v2789_v9  ;;  %v2143_v9 = vld [vmem:[%s3998_s26] sm:$0xff] }
 0x891   :  { %2791 = vmatprep.subr.bf16.mxu0 %v3320_v63 }
 0x894   :  { %2793 = vmatpush3.bf16.msra.mxu0 %v2792_v11  ;;  %v2810_v11 = vpack.c.bf16 %v2144_v10, %v2143_v9 }
 0x895   :  { %2800 = vmatprep.subr.bf16.mxu0 %v3320_v63 }
 0x897   :  { %2688 = vmatmul.mubr.msk.f32.vlgmr.msra.gmra.mrb[20].mxu0 %vm1211_vm11, %v3794_v23  ;;  %v430_v23 = vmax.f32 %v3782_v59, 0.0  ;;  %v1607_v59 = vld [vmem:[%s3995_s27 + $0x10] sm:$0xff] }
 0x898   :  { %2705 = vmatprep.mubr.msk.f32.mxu0 %vm3311_vm0, %v3310_v0 }
 0x959   :  { %v3840_v14 = vpop.f32.mrb[12].mxu1 }
 0x95a   :  { %v2647_v50 = vpop.f32.mrb[13].mxu1  ;;  %v1564_v51 = vpop.f32.mrb[14].mxu0 }
 0x95b   :  { %v1590_v52 = vmul.f32 %v1582_v37, %v1564_v51  ;;  %v2652_v53 = vpop.f32.mrb[15].mxu0 }
 0x95d   :  { %v1593_v54 = vsel %vm1211_vm11, %v1590_v52, 0.0 }
 0x95e   :  { %1594 = vadd.xlane.f32.xlu0 %v1593_v54  ;;  %v1569_v56 = vpop.f32.mrb[16].mxu0 }
 0x95f   :  { %v1591_v58 = vmul.f32 %v1584_v55, %v1569_v56  ;;  %v2655_v60 = vpop.f32.mrb[17].mxu0 }
 0x960   :  { %v1891_v60 = vld [vmem:[%s3997_s23 + $0x8] sm:$0xff] }
 0x961   :  { %v1596_v61 = vsel %vm1211_vm11, %v1591_v58, 0.0  ;;  %v1890_v58 = vld [vmem:[%s3997_s23] sm:$0xff] }
 0x962   :  { %1597 = vadd.xlane.f32.xlu1 %v1596_v61  ;;  %v1574_v2 = vpop.f32.mrb[18].mxu0  ;;  %v1892_v61 = vld [vmem:[%s3997_s23 + $0x10] sm:$0xff] }
 0x963   :  { %v1592_v3 = vmul.f32 %v1586_v62, %v1574_v2  ;;  %v2658_v4 = vpop.f32.mrb[19].mxu0  ;;  %v2795_v62 = vpack.c.bf16 %v1891_v60, %v1890_v58  ;;  %v1893_v2 = vld [vmem:[%s3997_s23 + $0x18] sm:$0xff] }
 0x965   :  { %v1599_v5 = vsel %vm1211_vm11, %v1592_v3, 0.0  ;;  %v2798_v3 = vpack.c.bf16 %v1893_v2, %v1892_v61 }
 0x966   :  { %1600 = vadd.xlane.f32.xlu0 %v1599_v5 }
 0x96a   :  { %v1860_v17 = vpop.f32.mrb[20].mxu0 }
 0x96b   :  { %v2689_v18 = vpop.f32.mrb[21].mxu0 }
 0x9eb   :  { %v1595_v12 = vpop.xlane.xlu0 %1594 }
 0x9ec   :  { %v1602_v13 = vadd.f32 %v1595_v12, %v3728_v25  ;;  %v1861_v25 = vadd.f32 %v2490_v20, %v1860_v17  ;;  %v2145_v12 = vld [vmem:[%s3998_s26 + $0x10] sm:$0xff]  ;;  %v2059_v20 = vld [vmem:[%s4000_s5] sm:$0xff]  ;;  %v2060_v17 = vld [vmem:[%s4000_s5 + $0x8] sm:$0xff] }
 0x9ee   :  { %1610 = vperm.xlu0 %2915, %v1602_v13   ;;  %v2146_v13 = vld [vmem:[%s3998_s26 + $0x18] sm:$0xff] }
 0x9ef   :  { %v1598_v15 = vpop.xlane.xlu1 %1597 }
 0x9f0   :  { %v1603_v16 = vadd.f32 %v1598_v15, %v3730_v26  ;;  %v1605_v26 = vld [vmem:[%s3995_s27] sm:$0xff] }
 0x9f2   :  { %1615 = vperm.xlu1 %2916, %v1603_v16   ;;  %v2813_v16 = vpack.c.bf16 %v2146_v13, %v2145_v12 }
 0x9f3   :  { %v1601_v39 = vpop.xlane.xlu0 %1600 }
 0x9f4   :  { %v1604_v19 = vadd.f32 %v1601_v39, %v3736_v38  ;;  %v1978_v39 = vld [vmem:[%s3999_s28 + $0x8] sm:$0xff] }
 0x9f6   :  { %1620 = vperm.xlu1 %2916, %v1604_v19  }
 0x9fa   :  { %1709 = vrot.lane.b32.xlu1 %v430_v23, %s3318_s10  ;;  %v2493_v23 = vld [vmem:[#allocation19] ss:$0 sm:$0xff] }
 0x9fe   :  { %1872 = vrot.lane.b32.xlu1 %v1861_v25, %s3317_s7 }
 0xa6d   :  { %v1611_v21 = vpop.permute.xlu0 %1610 }
 0xa6e   :  { %v1623_v24 = vmul.f32 %v1611_v21, %v1605_v26  ;;  %v2804_v21 = vpack.c.bf16 %v2060_v17, %v2059_v20 }
 0xa71   :  { %v1616_v38 = vpop.permute.xlu1 %1615 }
 0xa72   :  { %v1624_v27 = vmul.f32 %v1616_v38, %v1606_v22  ;;  %v2061_v38 = vld [vmem:[%s4000_s5 + $0x10] sm:$0xff] }
 0xa74   :  { %v2780_v28 = vpack.c.bf16 %v1624_v27, %v1623_v24  ;;  %v2062_v24 = vld [vmem:[%s4000_s5 + $0x18] sm:$0xff] }
 0xa75   :  { %v1621_v29 = vpop.permute.xlu1 %1620  ;;  %v2807_v27 = vpack.c.bf16 %v2062_v24, %v2061_v38 }
 0xa76   :  { %2781 = vmatpush3.bf16.msra.mxu1 %v2780_v28  ;;  %v1625_v32 = vmul.f32 %v1621_v29, %v1607_v59  ;;  %v2219_v29 = vld [vmem:[%s4001_s6] sm:$0xff] }
 0xa77   :  { %2663 = vmatprep.subr.mxu1 %v3310_v0 }
 0xa79   :  { %v1710_v41 = vpop.permute.xlu1 %1709 }
 0xa7a   :  { %2664 = vmatpush3.msra.mxu1 %v1625_v32 }
 0xa7b   :  { %2666 = vmatmul.mubr.msk.f32.vlgmr.msra.gmra.mrb[14].mxu1 %vm769_vm6, %v3746_v57  ;;  %2782 = vmatprep.subr.bf16.mxu1 %v3320_v63  ;;  %v1481_v57 = vadd.f32 %v2481_v42, %v3840_v14 }
 0xa7c   :  { %2784 = vmatpush3.bf16.msra.mxu1 %v2783_v33  ;;  %2676 = vmatprep.mubr.msk.f32.mxu1 %vm3311_vm0, %v3310_v0  ;;  %v2816_v33 = vpack.c.bf16 %v2220_v30, %v2219_v29 }
 0xa7d   :  { %2785 = vmatprep.subr.bf16.mxu1 %v3320_v63  ;;  %v1873_v53 = vpop.permute.xlu1 %1872 }
 0xa80   :  { %2787 = vmatpush3.bf16.msra.mxu1 %v2786_v36  ;;  %v2221_v36 = vld [vmem:[%s4001_s6 + $0x10] sm:$0xff] }
 0xa81   :  { %2794 = vmatprep.subr.bf16.mxu1 %v3320_v63 }
 0xa83   :  { %2677 = vmatmul.mubr.msk.f32.vlgmr.msra.gmra.mrb[16].mxu1 %vm1211_vm11, %v1710_v41  ;;  %v2222_v41 = vld [vmem:[%s4001_s6 + $0x18] sm:$0x3f] }
 0xa84   :  { %2698 = vmatprep.mubr.msk.f32.mxu1 %vm3311_vm0, %v3310_v0  ;;  %2796 = vmatpush3.bf16.msra.mxu1 %v2795_v62  ;;  %v2819_v42 = vpack.c.bf16 %v2222_v41, %v2221_v36 }
 0xa85   :  { %2797 = vmatprep.subr.bf16.mxu1 %v3320_v63 }
 0xa88   :  { %2799 = vmatpush3.bf16.msra.mxu1 %v2798_v3 }
 0xa89   :  { %2809 = vmatprep.subr.bf16.mxu1 %v3320_v63 }
 0xb4e   :  { %v1692_v43 = vpop.f32.mrb[14].mxu1 }
 0xb4f   :  { %v3880_v44 = vadd.f32 %v1692_v43, %v1481_v57  ;;  %v2667_v45 = vpop.f32.mrb[15].mxu1  ;;  %v2217_v57 = vld [vmem:[%s4002_s30] sm:$0x7] }
 0xb50   :  { %v2497_v45 = vld [vmem:[#allocation22] ss:$0 sm:$0xff] }
 0xb56   :  { %v1779_v47 = vpop.f32.mrb[16].mxu1 }
 0xb57   :  { %v1780_v48 = vadd.f32 %v2488_v46, %v1779_v47  ;;  %v2678_v49 = vpop.f32.mrb[17].mxu1 }
 0xb59   :  { %v1864_v37 = vadd.f32 %v1861_v25, %v1780_v48 }
 0xb5b   :  { %v2492_v50 = vmul.f32 -1.442695, %v1864_v37 }
 0xb5d   :  { %2923 = vpow2.f32 %v2492_v50  ;;  %v2301_v50 = vld [vmem:[%s4004_s17] sm:$0x3f] }
 0xb67   :  { %v2924_v51 = vpop.eup %2923 }
 0xb68   :  { %v1868_v52 = vadd.f32 1.0, %v2924_v51 }
 0xb6a   :  { %2925 = vrcp.f32 %v1868_v52 }
 0xb74   :  { %v2926_v14 = vpop.eup %2925 }
 0xb75   :  { %v1875_v54 = vmul.f32 %v2926_v14, %v1873_v53  ;;  %v1882_v5 = vsub.f32 1.0, %v2926_v14  ;;  %v1888_v6 = vmul.f32 %v2926_v14, %v3816_v40  ;;  %v1977_v40 = vld [vmem:[%s3999_s28] sm:$0xff] }
 0xb76   :  { %v2801_v19 = vpack.c.bf16 %v1978_v39, %v1977_v40 }
 0xb77   :  { %1877 = vrot.lane.b32.xlu1 %v1875_v54, %s3317_s7 }
 0xb78   :  { %2802 = vmatpush3.bf16.msra.mxu0 %v2801_v19 }
 0xb79   :  { %2803 = vmatprep.subr.bf16.mxu0 %v3320_v63 }
 0xbe9   :  { %v1878_v55 = vpop.permute.xlu1 %1877 }
 0xbea   :  { %v1880_v56 = vadd.f32 %v1878_v55, %v1780_v48 }
 0xbec   :  { %2927 = vtanh.f32 %v1880_v56 }
 0xbf6   :  { %v2928_v4 = vpop.eup %2927 }
 0xbf7   :  { %1884 = vrot.lane.b32.xlu1 %v2928_v4, %s3318_s10 }
 0xc69   :  { %v1885_v1 = vpop.permute.xlu1 %1884 }
 0xc6a   :  { %v1887_v7 = vmul.f32 %v1885_v1, %v1882_v5 }
 0xc6c   :  { %v1889_v8 = vadd.f32 %v1888_v6, %v1887_v7 }
 0xc6e   :  { %1902 = vrot.lane.b32.xlu1 %v1889_v8, %s3318_s10 }
 0xce0   :  { %v1903_v15 = vpop.permute.xlu1 %1902 }
 0xce1   :  { %2699 = vmatmul.mubr.msk.f32.vlgmr.msra.gmra.mrb[18].mxu1 %vm1211_vm11, %v1903_v15 }
 0xce2   :  { %2811 = vmatpush3.bf16.msra.mxu1 %v2810_v11  ;;  %2727 = vmatprep.mubr.msk.f32.mxu1 %vm3311_vm0, %v3310_v0 }
 0xce3   :  { %2812 = vmatprep.subr.bf16.mxu1 %v3320_v63 }
 0xce6   :  { %2814 = vmatpush3.bf16.msra.mxu1 %v2813_v16 }
 0xce7   :  { %2741 = vmatprep.subr.mxu1 %v3310_v0 }
 0xce9   :  { %2728 = vmatmul.mubr.msk.f32.vlgmr.msra.gmra.mrb[20].mxu1 %vm1211_vm11, %v1903_v15 }
 0xcea   :  { %2743 = vmatprep.mubr.msk.f32.mxu1 %vm3311_vm0, %v3310_v0 }
 0xdb4   :  { %v1972_v25 = vpop.f32.mrb[18].mxu1 }
 0xdb5   :  { %v1973_v18 = vadd.f32 %v2493_v23, %v1972_v25  ;;  %v2700_v26 = vpop.f32.mrb[19].mxu1 }
 0xdb7   :  { %v1976_v22 = vmax.f32 %v1973_v18, 0.0 }
 0xdb9   :  { %2706 = vmatmul.mubr.msk.f32.vlgmr.msra.gmra.mrb[22].mxu0 %vm552_vm5, %v1976_v22 }
 0xdba   :  { %2805 = vmatpush3.bf16.msra.mxu0 %v2804_v21  ;;  %2716 = vmatprep.mubr.msk.f32.mxu0 %vm3311_vm0, %v3310_v0 }
 0xdbb   :  { %2806 = vmatprep.subr.bf16.mxu0 %v3320_v63 }
 0xdbc   :  { %v2213_v28 = vpop.f32.mrb[20].mxu1 }
 0xdbd   :  { %v2729_v59 = vpop.f32.mrb[21].mxu1  ;;  %v2218_v43 = vmul.f32 %v2217_v57, %v2213_v28 }
 0xdbe   :  { %2808 = vmatpush3.bf16.msra.mxu0 %v2807_v27 }
 0xdbf   :  { %2815 = vmatprep.subr.bf16.mxu0 %v3320_v63 }
 0xe8c   :  { %v2055_v32 = vpop.f32.mrb[22].mxu0 }
 0xe8d   :  { %v2056_v34 = vadd.f32 %v2495_v31, %v2055_v32  ;;  %v2707_v35 = vpop.f32.mrb[23].mxu0 }
 0xe8f   :  { %2717 = vmatmul.mubr.msk.f32.vlgmr.msra.gmra.mrb[24].mxu0 %vm1211_vm11, %v2056_v34 }
 0xe90   :  { %2817 = vmatpush3.bf16.msra.mxu0 %v2816_v33  ;;  %2738 = vmatprep.mubr.msk.f32.mxu0 %vm3311_vm0, %v3310_v0  ;;  %v2223_v0 = vld [vmem:[%s4003_s1] sm:$0x7]  ;;  %vm2306_vm0 = vcmask 1042432  }
 0xe91   :  { %2818 = vmatprep.subr.bf16.mxu0 %v3320_v63 }
 0xe94   :  { %2821 = vmatpush3.bf16.msk.msra.mxu0 %vm2820_vm13, %v2819_v42 }
 0xe97   :  { %2739 = vmatmul.mubr.msk.f32.vlgmr.msra.gmra.mrb[26].mxu0 %vm2224_vm14, %v2218_v43 }
 0xf62   :  { %v2139_v46 = vpop.f32.mrb[24].mxu0 }
 0xf63   :  { %v2140_v47 = vadd.f32 %v2497_v45, %v2139_v46  ;;  %v2718_v48 = vpop.f32.mrb[25].mxu0 }
 0xf65   :  { %2388 = vst.msk [vmem:[%s3546_s19] sm:$0x3f] %vm2382_vm15, %v2140_v47 }
 0xf6a   :  { %v2297_v49 = vpop.f32.mrb[26].mxu0 }
 0xf6b   :  { %v2298_v37 = vadd.f32 %v2297_v49, %v2223_v0  ;;  %v2740_v63 = vpop.f32.mrb[27].mxu0 }
 0xf6d   :  { %2742 = vmatpush3.msk.msra.mxu1 %vm2306_vm0, %v2298_v37 }
 0xf6e   :  { %2744 = vmatmul.mubr.msk.f32.vlgmr.msra.gmra.mrb[22].mxu1 %vm2302_vm1, %v2301_v50 }
0x1041   :  { %v2376_v51 = vpop.f32.mrb[22].mxu1 }
0x1042   :  { %v2380_v52 = vadd.f32 %v2376_v51, %v3880_v44  ;;  %2387 = vst.msk [vmem:[%s3541_s13] sm:$0x3f] %vm2382_vm15, %v2376_v51  ;;  %v2745_v53 = vpop.f32.mrb[23].mxu1 }
0x1044   :  { %v2381_v14 = vadd.f32 %v2380_v52, %v2140_v47 }
0x1046   :  { %2383 = vst.msk [vmem:[%s3531_s14] sm:$0x3f] %vm2382_vm15, %v2381_v14 }
0x1047   :  { %2405 = vsyncpa [#allocation3], 1 }
0x1048   :  { %2406 = vsyncpa [#allocation5], 1 }
0x1049   :  { %2407 = vsyncpa [#allocation8], 1 }
0x104a   :  { %2408 = vsyncpa [#allocation11], 1 }
0x104b   :  { %2409 = vsyncpa [#allocation14], 1 }
0x104c   :  { %2410 = vsyncpa [#allocation17], 1 }
0x104d   :  { %2411 = vsyncpa [#allocation20], 1 }
0x104e   :  { %2412 = vsyncpa [#allocation23], 1 }

</bundles_post_ra>
